<compile_context>
chip_gen: v5e
topology: v5e:2x2
jax: 0.10.0
libtpu: 0.0.40
codegen_flags: <defaults>
</compile_context>

<pallas_src>
import functools

import jax
import jax.numpy as jnp
from jax.experimental import pallas as pl
from jax.experimental.pallas import tpu as pltpu


def _diffusion_kernel(x_ref, evecs_ref, mass_ref, evals_ref, t_ref,
                      out_ref, acc_ref, spec_ref):
    phase = pl.program_id(0)   # 0: to_basis accumulation, 1: from_basis
    vtile = pl.program_id(1)   # which V tile

    # ---- phase 0: x_spec += evecs_tile^T @ (x_tile * mass_tile) ----
    @pl.when(phase == 0)
    def _to_basis():
        @pl.when(vtile == 0)
        def _init():
            acc_ref[...] = jnp.zeros_like(acc_ref)

        xm = x_ref[...] * mass_ref[...]                          # (TV, C)
        # Contract over the V axis directly ("TN" matmul) -- avoids an XLU
        # transpose + VMEM round-trip of the (TV, K) evecs tile.
        acc_ref[...] += jax.lax.dot_general(
            evecs_ref[...], xm,
            dimension_numbers=(((0,), (0,)), ((), ())),
            preferred_element_type=jnp.float32)

    # ---- phase boundary: scale spectral coefficients exactly once ----
    @pl.when(jnp.logical_and(phase == 1, vtile == 0))
    def _scale_spec():
        t = jnp.maximum(jnp.abs(t_ref[...]), 1e-8)               # (1, C)
        coefs = jnp.exp(-evals_ref[...] * t)                     # (K, C)
        # Single cast to the MXU input dtype here (instead of once per V tile).
        spec_ref[...] = (acc_ref[...] * coefs).astype(spec_ref.dtype)

    # ---- phase 1: out_tile = evecs_tile @ x_diffuse_spec ----
    @pl.when(phase == 1)
    def _from_basis():
        out_ref[...] = jnp.dot(
            evecs_ref[...], spec_ref[...],
            preferred_element_type=jnp.float32).astype(out_ref.dtype)


def _round_up(a, m):
    return (a + m - 1) // m * m


def _pad2d(a, rows, cols):
    """Zero-pad a 2D array to (rows, cols); no-op (no HBM copy) if already sized."""
    r, c = a.shape
    if r == rows and c == cols:
        return a
    return jnp.pad(a, ((0, rows - r), (0, cols - c)))


@functools.partial(jax.jit, static_argnames=("tile_v",))
def learned_time_diffusion(x, mass, evals, evecs, diffusion_time, *, tile_v=1024):
    """Spectral LearnedTimeDiffusion forward.

    x: (V, C), mass: (V,), evals: (K,), evecs: (V, K), diffusion_time: (C,)
    Returns (V, C) diffused values (bf16 if x is bf16, else f32).
    tile_v=1024 keeps double-buffered tiles well under VMEM limits on
    v5e/v6e/v7x while staying near the HBM roofline.
    """
    V, C = x.shape
    K = evals.shape[0]
    assert evecs.shape == (V, K)
    assert diffusion_time.shape == (C,)
    assert tile_v % 8 == 0

    io_dtype = jnp.bfloat16 if x.dtype == jnp.bfloat16 else jnp.float32

    C_pad = _round_up(C, 128)       # lane-dense channels
    K_pad = _round_up(K, 8)         # clean sublane layout for the (K, C) spectral block
    V_pad = _round_up(V, tile_v)
    n_v = V_pad // tile_v
    last_v = n_v - 1

    # Zero padding is exact: padded evecs rows/cols and padded channels
    # contribute 0 to x_spec and to the output, and are sliced away below.
    x_p = _pad2d(x.astype(io_dtype), V_pad, C_pad)
    evecs_p = _pad2d(evecs.astype(io_dtype), V_pad, K_pad)
    mass_p = _pad2d(mass.astype(io_dtype)[:, None], V_pad, 1)
    evals_p = _pad2d(evals.astype(jnp.float32)[:, None], K_pad, 1)
    t_p = _pad2d(diffusion_time.astype(jnp.float32)[None, :], 1, C_pad)

    # x / mass are only needed in phase 0; pin them to the last tile during
    # phase 1 so no extra DMA traffic is issued there.
    x_map = lambda p, v: (v * (1 - p) + last_v * p, 0)
    evecs_map = lambda p, v: (v, 0)        # streamed in both phases
    const_map = lambda p, v: (0, 0)        # small resident blocks
    # Output stays pinned on block 0 through phase 0 (never flushed with
    # garbage, since the index only changes after it is fully written in
    # phase 1) and then follows the V tile.
    out_map = lambda p, v: (v * p, 0)

    out = pl.pallas_call(
        _diffusion_kernel,
        out_shape=jax.ShapeDtypeStruct((V_pad, C_pad), io_dtype),
        grid_spec=pltpu.PrefetchScalarGridSpec(
            num_scalar_prefetch=0,
            grid=(2, n_v),                               # (phase, V tile)
            in_specs=[
                pl.BlockSpec((tile_v, C_pad), x_map),      # x
                pl.BlockSpec((tile_v, K_pad), evecs_map),  # evecs
                pl.BlockSpec((tile_v, 1), x_map),          # mass   (V, 1)
                pl.BlockSpec((K_pad, 1), const_map),       # evals  (K, 1)
                pl.BlockSpec((1, C_pad), const_map),       # diffusion_time (1, C)
            ],
            out_specs=pl.BlockSpec((tile_v, C_pad), out_map),
            scratch_shapes=[
                pltpu.VMEM((K_pad, C_pad), jnp.float32),   # f32 spectral accumulator
                pltpu.VMEM((K_pad, C_pad), io_dtype),      # scaled coefs, MXU dtype
            ],
        ),
        compiler_params=pltpu.CompilerParams(
            dimension_semantics=("arbitrary", "arbitrary"),
        ),
    )(x_p, evecs_p, mass_p, evals_p, t_p)

    return out[:V, :C]


def _reference(x, mass, evals, evecs, diffusion_time):
    t = jnp.maximum(jnp.abs(diffusion_time), 1e-8)
    x_spec = evecs.T @ (x * mass[:, None])
    coefs = jnp.exp(-evals[:, None] * t[None, :])
    return evecs @ (coefs * x_spec)


if __name__ == "__main__":
    V, K, C = 1000, 32, 16   # vertices, eigenpairs, channels (small, deliberately un-padded)

    key = jax.random.PRNGKey(0)
    kx, kev, kval, km, kt = jax.random.split(key, 5)

    x = jax.random.normal(kx, (V, C), dtype=jnp.float32)
    evecs = jax.random.normal(kev, (V, K), dtype=jnp.float32) / jnp.sqrt(V)
    evals = jnp.abs(jax.random.normal(kval, (K,), dtype=jnp.float32))
    mass = jnp.abs(jax.random.normal(km, (V,), dtype=jnp.float32)) + 0.1

    # nn.Parameter(C_inout) with init_time=0.1, init_std=2.0 (deterministic here).
    diffusion_time = 0.1 + 2.0 * jax.random.normal(kt, (C,), dtype=jnp.float32)

    out = learned_time_diffusion(x, mass, evals, evecs, diffusion_time, tile_v=512)
    out = jax.block_until_ready(out)

    ref = _reference(x, mass, evals, evecs, diffusion_time)
    assert out.shape == (V, C)
    # Tolerance covers default (bf16-pass) MXU matmul precision differences
    # between the V-tiled kernel and the un-tiled XLA reference.
    assert jnp.allclose(out, ref, atol=1e-2, rtol=1e-2), "mismatch vs reference"

    # TODO(synk): 'implicit_dense' branch (batched Cholesky factorize + solve)
    # has no clean Pallas primitive; only the 'spectral' method is implemented.
    print("KERNEL_OK")
</pallas_src>

<mosaic_0001>
module attributes {stable_mosaic.version = 11 : i64} {
  func.func @_diffusion_kernel(%arg0: i32, %arg1: i32, %arg2: memref<512x128xf32, #tpu.memory_space<vmem>>, %arg3: memref<512x32xf32, #tpu.memory_space<vmem>>, %arg4: memref<512x1xf32, #tpu.memory_space<vmem>>, %arg5: memref<32x1xf32, #tpu.memory_space<vmem>>, %arg6: memref<1x128xf32, #tpu.memory_space<vmem>>, %arg7: memref<512x128xf32, #tpu.memory_space<vmem>>, %arg8: memref<32x128xf32, #tpu.memory_space<vmem>>, %arg9: memref<32x128xf32, #tpu.memory_space<vmem>>) attributes {dimension_semantics = [#tpu.dimension_semantics<arbitrary>, #tpu.dimension_semantics<arbitrary>], iteration_bounds = array<i64: 2, 2>, scalar_prefetch = 0 : i64, scratch_operands = 2 : i64, tpu.core_type = #tpu.core_type<tc>, window_params = [{transform_indices = @transform_0, window_bounds = array<i64: 512, 128>}, {transform_indices = @transform_1, window_bounds = array<i64: 512, 32>}, {transform_indices = @transform_2, window_bounds = array<i64: 512, 1>}, {pipeline_mode = #tpu.pipeline_mode<synchronous>, transform_indices = @transform_3, window_bounds = array<i64: 32, 1>}, {pipeline_mode = #tpu.pipeline_mode<synchronous>, transform_indices = @transform_4, window_bounds = array<i64: 1, 128>}, {transform_indices = @transform_5, window_bounds = array<i64: 512, 128>}]} {
    %c0_i32 = arith.constant 0 : i32
    %0 = arith.cmpi eq, %arg0, %c0_i32 : i32
    %1 = arith.extui %0 : i1 to i32
    %c0_i32_0 = arith.constant 0 : i32
    %2 = arith.cmpi ne, %1, %c0_i32_0 : i32
    scf.if %2 {
      %c0_i32_5 = arith.constant 0 : i32
      %11 = arith.cmpi eq, %arg1, %c0_i32_5 : i32
      %12 = arith.extui %11 : i1 to i32
      %c0_i32_6 = arith.constant 0 : i32
      %13 = arith.cmpi ne, %12, %c0_i32_6 : i32
      scf.if %13 {
        %cst_16 = arith.constant 0.000000e+00 : f32
        %23 = vector.broadcast %cst_16 : f32 to vector<32x128xf32>
        %c0_17 = arith.constant 0 : index
        %c0_18 = arith.constant 0 : index
        %24 = vector.load %arg8[%c0_17, %c0_18] : memref<32x128xf32, #tpu.memory_space<vmem>>, vector<32x128xf32>
        tpu.vector_store %arg8[%c0_17, %c0_18], %23 {strides = array<i32>} : memref<32x128xf32, #tpu.memory_space<vmem>>, vector<32x128xf32>,
      } else {
      }
      %c0 = arith.constant 0 : index
      %c0_7 = arith.constant 0 : index
      %14 = vector.load %arg2[%c0, %c0_7] : memref<512x128xf32, #tpu.memory_space<vmem>>, vector<512x128xf32>
      %c0_8 = arith.constant 0 : index
      %c0_9 = arith.constant 0 : index
      %15 = vector.load %arg4[%c0_8, %c0_9] : memref<512x1xf32, #tpu.memory_space<vmem>>, vector<512x1xf32>
      %16 = vector.broadcast %15 : vector<512x1xf32> to vector<512x128xf32>
      %17 = arith.mulf %14, %16 : vector<512x128xf32>
      %c0_10 = arith.constant 0 : index
      %c0_11 = arith.constant 0 : index
      %18 = vector.load %arg8[%c0_10, %c0_11] : memref<32x128xf32, #tpu.memory_space<vmem>>, vector<32x128xf32>
      %c0_12 = arith.constant 0 : index
      %c0_13 = arith.constant 0 : index
      %19 = vector.load %arg3[%c0_12, %c0_13] : memref<512x32xf32, #tpu.memory_space<vmem>>, vector<512x32xf32>
      %cst = arith.constant dense<0.000000e+00> : vector<32x128xf32>
      %20 = tpu.matmul %19, %17, %cst {dimension_numbers = #tpu.dot_dimension_numbers<[0], [0], [1], [1], [0, 1, 1, 1], [], []>} : vector<512x32xf32>, vector<512x128xf32>, vector<32x128xf32> -> vector<32x128xf32>
      %21 = arith.addf %18, %20 : vector<32x128xf32>
      %c0_14 = arith.constant 0 : index
      %c0_15 = arith.constant 0 : index
      %22 = vector.load %arg8[%c0_14, %c0_15] : memref<32x128xf32, #tpu.memory_space<vmem>>, vector<32x128xf32>
      tpu.vector_store %arg8[%c0_14, %c0_15], %21 {strides = array<i32>} : memref<32x128xf32, #tpu.memory_space<vmem>>, vector<32x128xf32>,
    } else {
    }
    %c1_i32 = arith.constant 1 : i32
    %3 = arith.cmpi eq, %arg0, %c1_i32 : i32
    %c0_i32_1 = arith.constant 0 : i32
    %4 = arith.cmpi eq, %arg1, %c0_i32_1 : i32
    %5 = arith.andi %3, %4 : i1
    %6 = arith.extui %5 : i1 to i32
    %c0_i32_2 = arith.constant 0 : i32
    %7 = arith.cmpi ne, %6, %c0_i32_2 : i32
    scf.if %7 {
      %c0 = arith.constant 0 : index
      %c0_5 = arith.constant 0 : index
      %11 = vector.load %arg6[%c0, %c0_5] : memref<1x128xf32, #tpu.memory_space<vmem>>, vector<1x128xf32>
      %12 = math.absf %11 : vector<1x128xf32>
      %cst = arith.constant 9.99999993E-9 : f32
      %13 = vector.broadcast %cst : f32 to vector<1x128xf32>
      %14 = arith.maximumf %12, %13 : vector<1x128xf32>
      %c0_6 = arith.constant 0 : index
      %c0_7 = arith.constant 0 : index
      %15 = vector.load %arg5[%c0_6, %c0_7] : memref<32x1xf32, #tpu.memory_space<vmem>>, vector<32x1xf32>
      %cst_8 = arith.constant 0.000000e+00 : f32
      %16 = vector.broadcast %cst_8 : f32 to vector<32x1xf32>
      %17 = arith.subf %16, %15 : vector<32x1xf32>
      %18 = vector.broadcast %17 : vector<32x1xf32> to vector<32x128xf32>
      %19 = vector.broadcast %14 : vector<1x128xf32> to vector<32x128xf32>
      %20 = arith.mulf %18, %19 : vector<32x128xf32>
      %21 = math.exp %20 : vector<32x128xf32>
      %c0_9 = arith.constant 0 : index
      %c0_10 = arith.constant 0 : index
      %22 = vector.load %arg8[%c0_9, %c0_10] : memref<32x128xf32, #tpu.memory_space<vmem>>, vector<32x128xf32>
      %23 = arith.mulf %22, %21 : vector<32x128xf32>
      %c0_11 = arith.constant 0 : index
      %c0_12 = arith.constant 0 : index
      %24 = vector.load %arg9[%c0_11, %c0_12] : memref<32x128xf32, #tpu.memory_space<vmem>>, vector<32x128xf32>
      tpu.vector_store %arg9[%c0_11, %c0_12], %23 {strides = array<i32>} : memref<32x128xf32, #tpu.memory_space<vmem>>, vector<32x128xf32>,
    } else {
    }
    %c1_i32_3 = arith.constant 1 : i32
    %8 = arith.cmpi eq, %arg0, %c1_i32_3 : i32
    %9 = arith.extui %8 : i1 to i32
    %c0_i32_4 = arith.constant 0 : i32
    %10 = arith.cmpi ne, %9, %c0_i32_4 : i32
    scf.if %10 {
      %c0 = arith.constant 0 : index
      %c0_5 = arith.constant 0 : index
      %11 = vector.load %arg3[%c0, %c0_5] : memref<512x32xf32, #tpu.memory_space<vmem>>, vector<512x32xf32>
      %c0_6 = arith.constant 0 : index
      %c0_7 = arith.constant 0 : index
      %12 = vector.load %arg9[%c0_6, %c0_7] : memref<32x128xf32, #tpu.memory_space<vmem>>, vector<32x128xf32>
      %cst = arith.constant dense<0.000000e+00> : vector<512x128xf32>
      %13 = tpu.matmul %11, %12, %cst {dimension_numbers = #tpu.dot_dimension_numbers<[1], [0], [0], [1], [0, 0, 1, 1], [], []>} : vector<512x32xf32>, vector<32x128xf32>, vector<512x128xf32> -> vector<512x128xf32>
      %c0_8 = arith.constant 0 : index
      %c0_9 = arith.constant 0 : index
      %14 = vector.load %arg7[%c0_8, %c0_9] : memref<512x128xf32, #tpu.memory_space<vmem>>, vector<512x128xf32>
      tpu.vector_store %arg7[%c0_8, %c0_9], %13 {strides = array<i32>} : memref<512x128xf32, #tpu.memory_space<vmem>>, vector<512x128xf32>,
    } else {
    }
    return
  }
  func.func @transform_0(%arg0: i32, %arg1: i32) -> (i32, i32) {
    %c1_i32 = arith.constant 1 : i32
    %0 = arith.subi %c1_i32, %arg0 : i32
    %1 = arith.muli %arg1, %0 : i32
    %c1_i32_0 = arith.constant 1 : i32
    %2 = arith.muli %c1_i32_0, %arg0 : i32
    %3 = arith.addi %1, %2 : i32
    %c0_i32 = arith.constant 0 : i32
    %c0_i32_1 = arith.constant 0 : i32
    return %3, %c0_i32 : i32, i32
  }
  func.func @transform_1(%arg0: i32, %arg1: i32) -> (i32, i32) {
    %c0_i32 = arith.constant 0 : i32
    %c0_i32_0 = arith.constant 0 : i32
    return %arg1, %c0_i32 : i32, i32
  }
  func.func @transform_2(%arg0: i32, %arg1: i32) -> (i32, i32) {
    %c1_i32 = arith.constant 1 : i32
    %0 = arith.subi %c1_i32, %arg0 : i32
    %1 = arith.muli %arg1, %0 : i32
    %c1_i32_0 = arith.constant 1 : i32
    %2 = arith.muli %c1_i32_0, %arg0 : i32
    %3 = arith.addi %1, %2 : i32
    %c0_i32 = arith.constant 0 : i32
    %c0_i32_1 = arith.constant 0 : i32
    return %3, %c0_i32 : i32, i32
  }
  func.func @transform_3(%arg0: i32, %arg1: i32) -> (i32, i32) {
    %c0_i32 = arith.constant 0 : i32
    %c0_i32_0 = arith.constant 0 : i32
    %c0_i32_1 = arith.constant 0 : i32
    return %c0_i32, %c0_i32_0 : i32, i32
  }
  func.func @transform_4(%arg0: i32, %arg1: i32) -> (i32, i32) {
    %c0_i32 = arith.constant 0 : i32
    %c0_i32_0 = arith.constant 0 : i32
    %c0_i32_1 = arith.constant 0 : i32
    return %c0_i32, %c0_i32_0 : i32, i32
  }
  func.func @transform_5(%arg0: i32, %arg1: i32) -> (i32, i32) {
    %0 = arith.muli %arg1, %arg0 : i32
    %c0_i32 = arith.constant 0 : i32
    %c0_i32_0 = arith.constant 0 : i32
    return %0, %c0_i32 : i32, i32
  }
}

</mosaic_0001>

<bundles_post_ra>
// kernel: learned_time_diffusion.1
= control target key start
LH: loop header
LB: loop body
LE: loop exit
PB: predicated region body
PF: predicated region fallthrough
CT: control target
= control target key end

     0   :  { %s2210_s18 = smov 0   ;;  %s2212_s19 = smov 0   ;;  %s2809_s0 = inlined_call_operand.vmem [shape: f32[1024,128], index: 0, kind: input, shape index: {}]   ;;  %s2810_s1 = inlined_call_operand.vmem [shape: f32[1024,32], index: 1, kind: input, shape index: {}]   ;;  %s2811_s2 = inlined_call_operand.vmem [shape: f32[1024,1], index: 2, kind: input, shape index: {}]   ;;  %s2812_s3 = inlined_call_operand.vmem [shape: f32[32,1], index: 3, kind: input, shape index: {}]   ;;  %s2813_s4 = inlined_call_operand.vmem [shape: f32[1,128], index: 4, kind: input, shape index: {}]   ;;  %s2814_s5 = inlined_call_operand.vmem [shape: f32[1024,128], index: 5, kind: output, shape index: {}]  }
   0x1   :  { %s2214_s20 = smov 0   ;;  %s2216_s21 = smov 0  }
   0x2   :  { %s2218_s22 = smov 0  }
   0x3 LB: > { %s24_s23 = sadd.s32 1, %s2167_s20  ;;  %s27_s24 = sadd.s32 1, %s2171_s21  ;;  %s2175_s22 = sphi %s2218_s22, %s15_s22   ;;  %s2171_s21 = sphi %s2216_s21, %s2818_s21   ;;  %s2167_s20 = sphi %s2214_s20, %s2817_s20   ;;  %s2163_s19 = sphi %s2212_s19, %s2816_s19   ;;  %s2159_s18 = sphi %s2210_s18, %s2815_s18  }
   0x4   : > { %p25_p0 = scmp.ge.s32.totalorder %s24_s23, 2  ;;  %p1875_p1 = scmp.ge.s32.totalorder %s2175_s22, 1 }
   0x5   : > { %p248_p2 = scmp.lt.s32.totalorder %s2175_s22, 5 }
   0x6   : > { %s2820_s23 = smov (%p25_p0, %s24_s23), 0  ;;  %s2822_s24 = smov (!%p25_p0, %s27_s24), %s2171_s21 }
   0x7   : > { %p249_p3 = pnand %p1875_p1, %p248_p2  ;;  %p29_p4 = scmp.ge.s32.totalorder %s2822_s24, 2 }
   0x8   : > { %s293_s25 = ssub.s32 (!%p249_p3), 1, %s2163_s19  ;;  %s1878_s26 = sshll.u32 (!%p249_p3), %s2159_s18, 6 }
   0x9   : > { %s2824_s24 = smov (%p29_p4, %s2822_s24), 0  ;;  %252 = sbr.rel (%p249_p3) target bundleno = 999 (0x3e7), region = 40 }
   0xa   : > { %s294_s27 = smul.u32 (!%p249_p3), %s2159_s18, %s293_s25  ;;  %p306_p5 = scmp.lt.s32.totalorder (!%p249_p3), %s1878_s26, 127 }
   0xb   : > { %s323_s28 = smul.u32 (!%p249_p3), %s2159_s18, %s2163_s19  ;;  %p1884_p8 = scmp.ne.s32.totalorder (!%p249_p3), %s2163_s19, 0 }
   0xc   : > { %s295_s29 = sadd.s32 (!%p249_p3), %s2163_s19, %s294_s27 }
   0xd   : > { %s1876_s30 = sshll.u32 (!%p249_p3), %s295_s29, 6  ;;  %s1882_s6 = sshll.u32 (!%p249_p3), %s323_s28, 6 }
   0xe   : > { %p297_p6 = scmp.lt.s32.totalorder %s1876_s30, 127  ;;  %p325_p7 = scmp.lt.s32.totalorder %s1882_s6, 127 }
   0xf   : > { %s2826_s26 = smov (!%p306_p5, %s1878_s26), 127  ;;  %p1885_p9 = scmp.ne.s32.totalorder (!%p1884_p8), %s2159_s18, 0 }
  0x10   : > { %s2828_s30 = smov (!%p297_p6, %s1876_s30), 127  ;;  %s1879_s7 = sshll.u32 %s2826_s26, 3 }
  0x11   : > { %s1877_s8 = sshll.u32 %s2828_s30, 3  ;;  %s2253_s11 = scalar_lea.vmem %s2810_s1, %s1879_s7 }
  0x12   : > { %s2258_s14 = scalar_lea.vmem %s2809_s0, %s1877_s8  ;;  %s2263_s17 = scalar_lea.vmem %s2811_s2, %s1877_s8 }
  0x13   : > { %s2830_s6 = smov (!%p325_p7, %s1882_s6), 127  ;;  %334 = sbr.rel (%p1884_p8) target bundleno = 580 (0x244), region = 44 }
  0x14   : > { %s1883_s25 = sshll.u32 %s2830_s6, 3 }
  0x15   : > { %s2268_s28 = scalar_lea.vmem %s2814_s5, %s1883_s25 }
  0x18   : > { %338 = sbr.rel (%p1885_p9) target bundleno = 34 (0x22), region = 48 }
  0x1d   : > { %v2177_v0 = vmov 0.0  }
  0x1e   : > { %339 = vst [vmem:[#allocation2 + $0x10] sm:$0xff] %v2177_v0 }
  0x1f   : > { %340 = vst [vmem:[#allocation2] sm:$0xff] %v2177_v0 }
  0x20   : > { %341 = vst [vmem:[#allocation2 + $0x18] sm:$0xff] %v2177_v0 }
  0x21   : > { %342 = vst [vmem:[#allocation2 + $0x8] sm:$0xff] %v2177_v0 }
  0x22 PF: > { %v411_v1 = vld [vmem:[%s2263_s17 + $0x20] sm:$0xff]  ;;  %v409_v2 = vld [vmem:[%s2263_s17 + $0x10] sm:$0xff]  ;;  %v2178_v4 = vmov 0   ;;  %v412_v5 = vld [vmem:[%s2263_s17 + $0x28] sm:$0xff] }
  0x23   : > { %v407_v3 = vld [vmem:[%s2263_s17] sm:$0xff]  ;;  %2022 = vset.pattern.permute.xlu2 %v2178_v4  ;;  %2021 = vset.pattern.permute.xlu1 %v2178_v4  ;;  %v410_v6 = vld [vmem:[%s2263_s17 + $0x18] sm:$0xff]  ;;  %v408_v7 = vld [vmem:[%s2263_s17 + $0x8] sm:$0xff] }
  0x24   : > { %2020 = vset.pattern.permute.xlu0 %v2178_v4  ;;  %493 = vperm.xlu2 %2022, %v411_v1   ;;  %v415_v8 = vld [vmem:[%s2263_s17 + $0x40] sm:$0xff]  ;;  %v414_v9 = vld [vmem:[%s2263_s17 + $0x38] sm:$0xff]  ;;  %v413_v10 = vld [vmem:[%s2263_s17 + $0x30] sm:$0xff] }
  0x25   : > { %483 = vperm.xlu1 %2021, %v409_v2   ;;  %473 = vperm.xlu0 %2020, %v407_v3   ;;  %v418_v11 = vld [vmem:[%s2263_s17 + $0x58] sm:$0xff]  ;;  %v417_v12 = vld [vmem:[%s2263_s17 + $0x50] sm:$0xff]  ;;  %v416_v13 = vld [vmem:[%s2263_s17 + $0x48] sm:$0xff] }
  0x26   : > { %v421_v14 = vld [vmem:[%s2263_s17 + $0x70] sm:$0xff]  ;;  %v420_v15 = vld [vmem:[%s2263_s17 + $0x68] sm:$0xff]  ;;  %v419_v16 = vld [vmem:[%s2263_s17 + $0x60] sm:$0xff] }
  0x27   : > { %v424_v17 = vld [vmem:[%s2263_s17 + $0x88] sm:$0xff]  ;;  %v423_v18 = vld [vmem:[%s2263_s17 + $0x80] sm:$0xff]  ;;  %v422_v19 = vld [vmem:[%s2263_s17 + $0x78] sm:$0xff] }
  0x28   : > { %v427_v20 = vld [vmem:[%s2263_s17 + $0xa0] sm:$0xff]  ;;  %v426_v21 = vld [vmem:[%s2263_s17 + $0x98] sm:$0xff]  ;;  %v425_v22 = vld [vmem:[%s2263_s17 + $0x90] sm:$0xff] }
  0x29   : > { %v430_v23 = vld [vmem:[%s2263_s17 + $0xb8] sm:$0xff]  ;;  %v429_v24 = vld [vmem:[%s2263_s17 + $0xb0] sm:$0xff]  ;;  %v428_v25 = vld [vmem:[%s2263_s17 + $0xa8] sm:$0xff] }
  0x2a   : > { %v433_v26 = vld [vmem:[%s2263_s17 + $0xd0] sm:$0xff]  ;;  %v432_v27 = vld [vmem:[%s2263_s17 + $0xc8] sm:$0xff]  ;;  %v431_v28 = vld [vmem:[%s2263_s17 + $0xc0] sm:$0xff] }
  0x2b   : > { %v436_v29 = vld [vmem:[%s2263_s17 + $0xe8] sm:$0xff]  ;;  %v435_v30 = vld [vmem:[%s2263_s17 + $0xe0] sm:$0xff]  ;;  %v434_v31 = vld [vmem:[%s2263_s17 + $0xd8] sm:$0xff] }
  0x2c   : > { %498 = vperm.xlu2 %2022, %v412_v5   ;;  %v439_v32 = vld [vmem:[%s2263_s17 + $0x100] sm:$0xff]  ;;  %v438_v33 = vld [vmem:[%s2263_s17 + $0xf8] sm:$0xff]  ;;  %v437_v34 = vld [vmem:[%s2263_s17 + $0xf0] sm:$0xff] }
  0x2d   : > { %488 = vperm.xlu1 %2021, %v410_v6   ;;  %478 = vperm.xlu0 %2020, %v408_v7   ;;  %v442_v35 = vld [vmem:[%s2263_s17 + $0x118] sm:$0xff]  ;;  %v441_v36 = vld [vmem:[%s2263_s17 + $0x110] sm:$0xff]  ;;  %v440_v37 = vld [vmem:[%s2263_s17 + $0x108] sm:$0xff] }
  0x2e   : > { %v445_v39 = vld [vmem:[%s2263_s17 + $0x130] sm:$0xff]  ;;  %v444_v40 = vld [vmem:[%s2263_s17 + $0x128] sm:$0xff]  ;;  %v443_v41 = vld [vmem:[%s2263_s17 + $0x120] sm:$0xff] }
  0x2f   : > { %v448_v43 = vld [vmem:[%s2263_s17 + $0x148] sm:$0xff]  ;;  %v447_v44 = vld [vmem:[%s2263_s17 + $0x140] sm:$0xff]  ;;  %v446_v45 = vld [vmem:[%s2263_s17 + $0x138] sm:$0xff] }
  0x30   : > { %v451_v47 = vld [vmem:[%s2263_s17 + $0x160] sm:$0xff]  ;;  %v450_v48 = vld [vmem:[%s2263_s17 + $0x158] sm:$0xff]  ;;  %v449_v49 = vld [vmem:[%s2263_s17 + $0x150] sm:$0xff] }
  0x31   : > { %v454_v53 = vld [vmem:[%s2263_s17 + $0x178] sm:$0xff]  ;;  %v453_v54 = vld [vmem:[%s2263_s17 + $0x170] sm:$0xff]  ;;  %v452_v55 = vld [vmem:[%s2263_s17 + $0x168] sm:$0xff] }
  0x32   : > { %v457_v59 = vld [vmem:[%s2263_s17 + $0x190] sm:$0xff]  ;;  %v456_v60 = vld [vmem:[%s2263_s17 + $0x188] sm:$0xff]  ;;  %v455_v61 = vld [vmem:[%s2263_s17 + $0x180] sm:$0xff] }
  0x33   : > { %v460_v1 = vld [vmem:[%s2263_s17 + $0x1a8] sm:$0xff]  ;;  %v459_v2 = vld [vmem:[%s2263_s17 + $0x1a0] sm:$0xff]  ;;  %v458_v3 = vld [vmem:[%s2263_s17 + $0x198] sm:$0xff] }
  0x34   : > { %513 = vperm.xlu2 %2022, %v415_v8   ;;  %v463_v7 = vld [vmem:[%s2263_s17 + $0x1c0] sm:$0xff]  ;;  %v462_v8 = vld [vmem:[%s2263_s17 + $0x1b8] sm:$0xff] }
  0x35   : > { %508 = vperm.xlu1 %2021, %v414_v9   ;;  %503 = vperm.xlu0 %2020, %v413_v10   ;;  %v461_v9 = vld [vmem:[%s2263_s17 + $0x1b0] sm:$0xff] }
  0x3c   : > { %528 = vperm.xlu2 %2022, %v418_v11  }
  0x3d   : > { %523 = vperm.xlu1 %2021, %v417_v12   ;;  %518 = vperm.xlu0 %2020, %v416_v13   ;;  %v470_v13 = vld [vmem:[%s2263_s17 + $0x1f8] sm:$0xff] }
  0x44   : > { %543 = vperm.xlu2 %2022, %v421_v14   ;;  %v465_v14 = vld [vmem:[%s2263_s17 + $0x1d0] sm:$0xff] }
  0x45   : > { %538 = vperm.xlu1 %2021, %v420_v15   ;;  %533 = vperm.xlu0 %2020, %v419_v16   ;;  %v464_v15 = vld [vmem:[%s2263_s17 + $0x1c8] sm:$0xff]  ;;  %v358_v16 = vld [vmem:[%s2258_s14 + $0x78] sm:$0xff] }
  0x4c   : > { %558 = vperm.xlu2 %2022, %v424_v17  }
  0x4d   : > { %553 = vperm.xlu1 %2021, %v423_v18   ;;  %548 = vperm.xlu0 %2020, %v422_v19   ;;  %v357_v18 = vld [vmem:[%s2258_s14 + $0x70] sm:$0xff] }
  0x54   : > { %573 = vperm.xlu2 %2022, %v427_v20  }
  0x55   : > { %568 = vperm.xlu1 %2021, %v426_v21   ;;  %563 = vperm.xlu0 %2020, %v425_v22   ;;  %v356_v22 = vld [vmem:[%s2258_s14 + $0x68] sm:$0xff] }
  0x5c   : > { %588 = vperm.xlu2 %2022, %v430_v23   ;;  %v355_v23 = vld [vmem:[%s2258_s14 + $0x60] sm:$0xff] }
  0x5d   : > { %583 = vperm.xlu1 %2021, %v429_v24   ;;  %578 = vperm.xlu0 %2020, %v428_v25   ;;  %v467_v24 = vld [vmem:[%s2263_s17 + $0x1e0] sm:$0xff] }
  0x64   : > { %603 = vperm.xlu2 %2022, %v433_v26   ;;  %v468_v26 = vld [vmem:[%s2263_s17 + $0x1e8] sm:$0xff] }
  0x65   : > { %598 = vperm.xlu1 %2021, %v432_v27   ;;  %593 = vperm.xlu0 %2020, %v431_v28   ;;  %v469_v27 = vld [vmem:[%s2263_s17 + $0x1f0] sm:$0xff] }
  0x6c   : > { %618 = vperm.xlu2 %2022, %v436_v29  }
  0x6d   : > { %613 = vperm.xlu1 %2021, %v435_v30   ;;  %608 = vperm.xlu0 %2020, %v434_v31   ;;  %v354_v30 = vld [vmem:[%s2258_s14 + $0x58] sm:$0xff] }
  0x74   : > { %633 = vperm.xlu2 %2022, %v439_v32   ;;  %v353_v32 = vld [vmem:[%s2258_s14 + $0x50] sm:$0xff] }
  0x75   : > { %628 = vperm.xlu1 %2021, %v438_v33   ;;  %623 = vperm.xlu0 %2020, %v437_v34   ;;  %v352_v33 = vld [vmem:[%s2258_s14 + $0x48] sm:$0xff] }
  0x7c   : > { %648 = vperm.xlu2 %2022, %v442_v35  }
  0x7d   : > { %643 = vperm.xlu1 %2021, %v441_v36   ;;  %638 = vperm.xlu0 %2020, %v440_v37  }
  0x7e   : > { %v2308_v38 = vpop.permute.xlu2 %493 }
  0x84   : > { %663 = vperm.xlu2 %2022, %v445_v39  }
  0x85   : > { %658 = vperm.xlu1 %2021, %v444_v40   ;;  %653 = vperm.xlu0 %2020, %v443_v41   ;;  %v466_v40 = vld [vmem:[%s2263_s17 + $0x1d8] sm:$0xff]  ;;  %v351_v41 = vld [vmem:[%s2258_s14 + $0x40] sm:$0xff] }
  0x86   : > { %v2313_v42 = vpop.permute.xlu2 %498 }
  0x8c   : > { %678 = vperm.xlu2 %2022, %v448_v43   ;;  %v350_v43 = vld [vmem:[%s2258_s14 + $0x38] sm:$0xff] }
  0x8d   : > { %673 = vperm.xlu1 %2021, %v447_v44   ;;  %668 = vperm.xlu0 %2020, %v446_v45   ;;  %v349_v44 = vld [vmem:[%s2258_s14 + $0x30] sm:$0xff] }
  0x8e   : > { %v2318_v46 = vpop.permute.xlu2 %513 }
  0x8f   : > { %v799_v45 = vmul.f32 %v2318_v46, %v351_v41  ;;  %v877_v41 = vld [vmem:[%s2253_s11 + $0x90] sm:$0xff] }
  0x94   : > { %693 = vperm.xlu2 %2022, %v451_v47  }
  0x95   : > { %688 = vperm.xlu1 %2021, %v450_v48   ;;  %683 = vperm.xlu0 %2020, %v449_v49  }
  0x96   : > { %v2323_v50 = vpop.permute.xlu2 %528 }
  0x97   : > { %v2325_v51 = vpop.permute.xlu1 %483  ;;  %v2327_v52 = vpop.permute.xlu0 %473  ;;  %v802_v36 = vmul.f32 %v2323_v50, %v354_v30 }
  0x9c   : > { %708 = vperm.xlu2 %2022, %v454_v53  }
  0x9d   : > { %703 = vperm.xlu1 %2021, %v453_v54   ;;  %698 = vperm.xlu0 %2020, %v452_v55   ;;  %v348_v54 = vld [vmem:[%s2258_s14 + $0x28] sm:$0xff]  ;;  %v347_v55 = vld [vmem:[%s2258_s14 + $0x20] sm:$0xff] }
  0x9e   : > { %v544_v56 = vpop.permute.xlu2 %543  ;;  %v796_v46 = vmul.f32 %v2313_v42, %v348_v54 }
  0x9f   : > { %v2332_v57 = vpop.permute.xlu1 %488  ;;  %v2334_v58 = vpop.permute.xlu0 %478  ;;  %v805_v25 = vmul.f32 %v544_v56, %v357_v18  ;;  %v346_v56 = vld [vmem:[%s2258_s14 + $0x18] sm:$0xff]  ;;  %v371_v18 = vld [vmem:[%s2258_s14 + $0xe0] sm:$0xff] }
  0xa4   : > { %723 = vperm.xlu2 %2022, %v457_v59   ;;  %v795_v59 = vmul.f32 %v2308_v38, %v347_v55 }
  0xa5   : > { %718 = vperm.xlu1 %2021, %v456_v60   ;;  %713 = vperm.xlu0 %2020, %v455_v61   ;;  %v345_v61 = vld [vmem:[%s2258_s14 + $0x10] sm:$0xff] }
  0xa6   : > { %v2339_v62 = vpop.permute.xlu2 %558  ;;  %v793_v42 = vmul.f32 %v2325_v51, %v345_v61  ;;  %v374_v51 = vld [vmem:[%s2258_s14 + $0xf8] sm:$0xff]  ;;  %v364_v61 = vld [vmem:[%s2258_s14 + $0xa8] sm:$0xff] }
  0xa7   : > { %v2341_v63 = vpop.permute.xlu1 %508  ;;  %v2343_v0 = vpop.permute.xlu0 %503 }
  0xa8   : > { %v798_v50 = vmul.f32 %v2341_v63, %v350_v43  ;;  %v797_v53 = vmul.f32 %v2343_v0, %v349_v44  ;;  %v909_v43 = vld [vmem:[%s2253_s11 + $0x190] sm:$0xff]  ;;  %v366_v44 = vld [vmem:[%s2258_s14 + $0xb8] sm:$0xff] }
  0xac   : > { %738 = vperm.xlu2 %2022, %v460_v1   ;;  %v344_v1 = vld [vmem:[%s2258_s14 + $0x8] sm:$0xff] }
  0xad   : > { %733 = vperm.xlu1 %2021, %v459_v2   ;;  %728 = vperm.xlu0 %2020, %v458_v3   ;;  %v794_v2 = vmul.f32 %v2332_v57, %v346_v56  ;;  %v343_v3 = vld [vmem:[%s2258_s14] sm:$0xff]  ;;  %v2079_v56 = vpack.i.bf16 %v877_v41, %v909_v43  ;;  %v386_v41 = vld [vmem:[%s2258_s14 + $0x158] sm:$0xff] }
  0xae   : > { %v2348_v4 = vpop.permute.xlu2 %573  ;;  %v791_v38 = vmul.f32 %v2327_v52, %v343_v3  ;;  %v875_v57 = vld [vmem:[%s2253_s11 + $0x80] sm:$0xff] }
  0xaf   : > { %v524_v5 = vpop.permute.xlu1 %523  ;;  %v519_v6 = vpop.permute.xlu0 %518  ;;  %v863_v43 = vld [vmem:[%s2253_s11 + $0x20] sm:$0xff] }
  0xb0   : > { %v801_v37 = vmul.f32 %v524_v5, %v353_v32  ;;  %v800_v39 = vmul.f32 %v519_v6, %v352_v33  ;;  %v792_v5 = vmul.f32 %v2334_v58, %v344_v1  ;;  %v367_v33 = vld [vmem:[%s2258_s14 + $0xc0] sm:$0xff] }
  0xb4   : > { %753 = vperm.xlu2 %2022, %v463_v7  }
  0xb5   : > { %748 = vperm.xlu1 %2021, %v462_v8   ;;  %743 = vperm.xlu0 %2020, %v461_v9   ;;  %v907_v9 = vld [vmem:[%s2253_s11 + $0x180] sm:$0xff] }
  0xb6   : > { %v2353_v10 = vpop.permute.xlu2 %588 }
  0xb7   : > { %v539_v11 = vpop.permute.xlu1 %538  ;;  %v534_v12 = vpop.permute.xlu0 %533 }
  0xb8   : > { %v804_v28 = vmul.f32 %v539_v11, %v356_v22  ;;  %v803_v29 = vmul.f32 %v534_v12, %v355_v23  ;;  %v2075_v11 = vpack.i.bf16 %v875_v57, %v907_v9  ;;  %v370_v23 = vld [vmem:[%s2258_s14 + $0xd8] sm:$0xff] }
  0xbc   : > { %788 = vperm.xlu2 %2022, %v470_v13   ;;  %v373_v13 = vld [vmem:[%s2258_s14 + $0xf0] sm:$0xff] }
  0xbd   : > { %763 = vperm.xlu1 %2021, %v465_v14   ;;  %758 = vperm.xlu0 %2020, %v464_v15   ;;  %v372_v15 = vld [vmem:[%s2258_s14 + $0xe8] sm:$0xff] }
  0xbe   : > { %v2359_v17 = vpop.permute.xlu2 %603 }
  0xbf   : > { %v2362_v19 = vpop.permute.xlu1 %553  ;;  %v549_v20 = vpop.permute.xlu0 %548 }
  0xc0   : > { %v806_v21 = vmul.f32 %v549_v20, %v358_v16  ;;  %v876_v20 = vld [vmem:[%s2253_s11 + $0x88] sm:$0xff] }
  0xc2   : > { %1051 = vmatpush.msra.mxu0 %v806_v21  ;;  %v908_v21 = vld [vmem:[%s2253_s11 + $0x188] sm:$0xff] }
  0xc4   : > { %1052 = vmatpush.msra.mxu0 %v805_v25  ;;  %773 = vperm.xlu2 %2022, %v467_v24  }
  0xc5   : > { %778 = vperm.xlu1 %2021, %v468_v26   ;;  %783 = vperm.xlu0 %2020, %v469_v27   ;;  %v2077_v26 = vpack.i.bf16 %v876_v20, %v908_v21  ;;  %v369_v27 = vld [vmem:[%s2258_s14 + $0xd0] sm:$0xff] }
  0xc6   : > { %1053 = vmatpush.msra.mxu0 %v804_v28  ;;  %v2370_v31 = vpop.permute.xlu2 %618  ;;  %v817_v32 = vmul.f32 %v2359_v17, %v369_v27 }
  0xc7   : > { %v2374_v34 = vpop.permute.xlu1 %568  ;;  %v2376_v35 = vpop.permute.xlu0 %563  ;;  %v820_v22 = vmul.f32 %v2370_v31, %v372_v15  ;;  %v368_v31 = vld [vmem:[%s2258_s14 + $0xc8] sm:$0xff]  ;;  %v879_v15 = vld [vmem:[%s2253_s11 + $0xa0] sm:$0xff] }
  0xc8   : > { %1054 = vmatpush.msra.mxu0 %v803_v29 }
  0xca   : > { %1055 = vmatpush.msra.mxu0 %v802_v36  ;;  %v859_v36 = vld [vmem:[%s2253_s11] sm:$0xff] }
  0xcc   : > { %1056 = vmatpush.msra.mxu0 %v801_v37  ;;  %v891_v37 = vld [vmem:[%s2253_s11 + $0x100] sm:$0xff] }
  0xcd   : > { %768 = vperm.xlu0 %2020, %v466_v40   ;;  %v390_v40 = vld [vmem:[%s2258_s14 + $0x178] sm:$0xff]  ;;  %v2023_v17 = vpack.i.bf16 %v891_v37, %v859_v36 }
  0xce   : > { %1057 = vmatpush.msra.mxu0 %v800_v39  ;;  %v2384_v47 = vpop.permute.xlu2 %633 }
  0xcf   : > { %v2386_v48 = vpop.permute.xlu1 %583  ;;  %v2388_v49 = vpop.permute.xlu0 %578 }
  0xd0   : > { %1058 = vmatpush.msra.mxu0 %v799_v45  ;;  %v812_v3 = vmul.f32 %v2388_v49, %v364_v61 }
  0xd2   : > { %1059 = vmatpush.msra.mxu0 %v798_v50 }
  0xd4   : > { %1060 = vmatpush.msra.mxu0 %v797_v53  ;;  %v365_v53 = vld [vmem:[%s2258_s14 + $0xb0] sm:$0xff] }
  0xd5   : > { %v813_v1 = vmul.f32 %v2386_v48, %v365_v53  ;;  %v913_v53 = vld [vmem:[%s2253_s11 + $0x1b0] sm:$0xff] }
  0xd6   : > { %1061 = vmatpush.msra.mxu0 %v796_v46  ;;  %v2397_v60 = vpop.permute.xlu2 %648 }
  0xd7   : > { %v599_v63 = vpop.permute.xlu1 %598  ;;  %v594_v0 = vpop.permute.xlu0 %593 }
  0xd8   : > { %1062 = vmatpush.msra.mxu0 %v795_v59  ;;  %v816_v39 = vmul.f32 %v599_v63, %v368_v31  ;;  %v815_v45 = vmul.f32 %v594_v0, %v367_v33  ;;  %v814_v59 = vmul.f32 %v2353_v10, %v366_v44  ;;  %v363_v63 = vld [vmem:[%s2258_s14 + $0xa0] sm:$0xff]  ;;  %v860_v0 = vld [vmem:[%s2253_s11 + $0x8] sm:$0xff]  ;;  %v362_v10 = vld [vmem:[%s2258_s14 + $0x98] sm:$0xff] }
  0xd9   : > { %v388_v33 = vld [vmem:[%s2258_s14 + $0x168] sm:$0xff]  ;;  %v895_v44 = vld [vmem:[%s2253_s11 + $0x120] sm:$0xff] }
  0xda   : > { %1063 = vmatpush.msra.mxu0 %v794_v2  ;;  %v892_v2 = vld [vmem:[%s2253_s11 + $0x108] sm:$0xff]  ;;  %v2031_v61 = vpack.i.bf16 %v895_v44, %v863_v43  ;;  %v899_v43 = vld [vmem:[%s2253_s11 + $0x140] sm:$0xff]  ;;  %v885_v44 = vld [vmem:[%s2253_s11 + $0xd0] sm:$0xff] }
  0xdc   : > { %1064 = vmatpush.msra.mxu0 %v793_v42  ;;  %v878_v42 = vld [vmem:[%s2253_s11 + $0x98] sm:$0xff] }
  0xde   : > { %v2406_v6 = vpop.permute.xlu2 %663  ;;  %1065 = vmatpush.msra.mxu0 %v792_v5  ;;  %v910_v5 = vld [vmem:[%s2253_s11 + $0x198] sm:$0xff] }
  0xdf   : > { %v614_v7 = vpop.permute.xlu1 %613  ;;  %v609_v8 = vpop.permute.xlu0 %608  ;;  %v2081_v49 = vpack.i.bf16 %v878_v42, %v910_v5  ;;  %v383_v42 = vld [vmem:[%s2258_s14 + $0x140] sm:$0xff] }
  0xe0   : > { %1066 = vmatpush.msra.mxu0 %v791_v38  ;;  %v819_v24 = vmul.f32 %v614_v7, %v371_v18  ;;  %v818_v30 = vmul.f32 %v609_v8, %v370_v23  ;;  %v811_v38 = vmul.f32 %v2348_v4, %v363_v63  ;;  %v2025_v7 = vpack.i.bf16 %v892_v2, %v860_v0  ;;  %v361_v8 = vld [vmem:[%s2258_s14 + $0x90] sm:$0xff]  ;;  %v359_v4 = vld [vmem:[%s2258_s14 + $0x80] sm:$0xff]  ;;  %v894_v23 = vld [vmem:[%s2253_s11 + $0x118] sm:$0xff] }
  0xe6   : > { %v2411_v58 = vpop.permute.xlu2 %678 }
  0xe7   : > { %v629_v12 = vpop.permute.xlu1 %628  ;;  %v624_v52 = vpop.permute.xlu0 %623 }
  0xe8   : > { %v822_v14 = vmul.f32 %v629_v12, %v374_v51  ;;  %v821_v16 = vmul.f32 %v624_v52, %v373_v13  ;;  %v810_v51 = vmul.f32 %v2374_v34, %v362_v10  ;;  %v809_v12 = vmul.f32 %v2376_v35, %v361_v8  ;;  %v861_v52 = vld [vmem:[%s2253_s11 + $0x10] sm:$0xff]  ;;  %v911_v34 = vld [vmem:[%s2253_s11 + $0x1a0] sm:$0xff]  ;;  %v382_v10 = vld [vmem:[%s2258_s14 + $0x138] sm:$0xff] }
  0xe9   : > { %v893_v13 = vld [vmem:[%s2253_s11 + $0x110] sm:$0xff] }
  0xea   : > { %1080 = vmatpush.msra.mxu1 %v822_v14  ;;  %2076 = vxpose.xlu2.b32.start [1/16] (narrow) %v2075_v11, 32  ;;  %v360_v11 = vld [vmem:[%s2258_s14 + $0x88] sm:$0xff]  ;;  %v2027_v18 = vpack.i.bf16 %v893_v13, %v861_v52 }
  0xeb   : > { %v808_v14 = vmul.f32 %v2339_v62, %v360_v11  ;;  %v862_v62 = vld [vmem:[%s2253_s11 + $0x18] sm:$0xff]  ;;  %v381_v11 = vld [vmem:[%s2258_s14 + $0x130] sm:$0xff] }
  0xec   : > { %1081 = vmatpush.msra.mxu1 %v821_v16  ;;  %v807_v16 = vmul.f32 %v2362_v19, %v359_v4  ;;  %v389_v19 = vld [vmem:[%s2258_s14 + $0x170] sm:$0xff]  ;;  %v380_v4 = vld [vmem:[%s2258_s14 + $0x128] sm:$0xff] }
  0xee   : > { %1082 = vmatpush.msra.mxu1 %v820_v22  ;;  %v2420_v25 = vpop.permute.xlu2 %693  ;;  %v2083_v22 = vpack.i.bf16 %v879_v15, %v911_v34  ;;  %v379_v15 = vld [vmem:[%s2258_s14 + $0x120] sm:$0xff] }
  0xef   : > { %v2423_v28 = vpop.permute.xlu1 %643  ;;  %v2425_v29 = vpop.permute.xlu0 %638 }
  0xf0   : > { %1083 = vmatpush.msra.mxu1 %v819_v24  ;;  %v880_v24 = vld [vmem:[%s2253_s11 + $0xa8] sm:$0xff] }
  0xf2   : > { %1084 = vmatpush.msra.mxu1 %v818_v30  ;;  %2078 = vxpose.xlu2.b32.cont [2/16] (narrow) %v2077_v26, 32  ;;  %v912_v26 = vld [vmem:[%s2253_s11 + $0x1a8] sm:$0xff]  ;;  %v2029_v30 = vpack.i.bf16 %v894_v23, %v862_v62 }
  0xf3   : > { %v2085_v36 = vpack.i.bf16 %v880_v24, %v912_v26 }
  0xf4   : > { %1085 = vmatpush.msra.mxu1 %v817_v32 }
  0xf6   : > { %1086 = vmatpush.msra.mxu1 %v816_v39  ;;  %v709_v50 = vpop.permute.xlu2 %708  ;;  %v387_v39 = vld [vmem:[%s2258_s14 + $0x160] sm:$0xff] }
  0xf7   : > { %v2437_v54 = vpop.permute.xlu1 %658  ;;  %v2439_v55 = vpop.permute.xlu0 %653  ;;  %v838_v46 = vmul.f32 %v709_v50, %v390_v40  ;;  %v406_v50 = vld [vmem:[%s2258_s14 + $0x1f8] sm:$0xff] }
  0xf8   : > { %1087 = vmatpush.msra.mxu1 %v815_v45  ;;  %v835_v45 = vmul.f32 %v2420_v25, %v387_v39  ;;  %v828_v34 = vmul.f32 %v2437_v54, %v380_v4  ;;  %v376_v54 = vld [vmem:[%s2258_s14 + $0x108] sm:$0xff]  ;;  %v399_v4 = vld [vmem:[%s2258_s14 + $0x1c0] sm:$0xff] }
  0xf9   : > { %1109 = vmatpush.msra.mxu2 %v838_v46  ;;  %v385_v46 = vld [vmem:[%s2258_s14 + $0x150] sm:$0xff] }
  0xfa   : > { %2024 = vxpose.xlu1.b32.start [1/16] (narrow) %v2023_v17, 32  ;;  %1088 = vmatpush.msra.mxu1 %v814_v59  ;;  %v881_v17 = vld [vmem:[%s2253_s11 + $0xb0] sm:$0xff] }
  0xfb   : > { %2080 = vxpose.xlu2.b32.cont [3/16] (narrow) %v2079_v56, 32  ;;  %v2087_v2 = vpack.i.bf16 %v881_v17, %v913_v53  ;;  %v404_v53 = vld [vmem:[%s2258_s14 + $0x1e8] sm:$0xff] }
  0xfc   : > { %1089 = vmatpush.msra.mxu1 %v813_v1  ;;  %v384_v1 = vld [vmem:[%s2258_s14 + $0x148] sm:$0xff] }
  0xfd   : > { %v832_v5 = vmul.f32 %v2411_v58, %v384_v1  ;;  %v403_v1 = vld [vmem:[%s2258_s14 + $0x1e0] sm:$0xff] }
  0xfe   : > { %1090 = vmatpush.msra.mxu1 %v812_v3  ;;  %v2452_v48 = vpop.permute.xlu2 %723 }
  0xff   : > { %v2455_v57 = vpop.permute.xlu1 %673  ;;  %v2457_v9 = vpop.permute.xlu0 %668 }
 0x100   : > { %1091 = vmatpush.msra.mxu1 %v811_v38  ;;  %v864_v38 = vld [vmem:[%s2253_s11 + $0x28] sm:$0xff]  ;;  %v831_v8 = vmul.f32 %v2455_v57, %v383_v42 }
 0x102   : > { %2026 = vxpose.xlu1.b32.cont [2/16] (narrow) %v2025_v7, 32  ;;  %1092 = vmatpush.msra.mxu1 %v810_v51  ;;  %v896_v7 = vld [vmem:[%s2253_s11 + $0x128] sm:$0xff]  ;;  %v914_v51 = vld [vmem:[%s2253_s11 + $0x1b8] sm:$0xff] }
 0x103   : > { %2082 = vxpose.xlu2.b32.cont [4/16] (narrow) %v2081_v49, 32  ;;  %v882_v49 = vld [vmem:[%s2253_s11 + $0xb8] sm:$0xff]  ;;  %v2033_v58 = vpack.i.bf16 %v896_v7, %v864_v38 }
 0x104   : > { %1093 = vmatpush.msra.mxu1 %v809_v12  ;;  %v830_v12 = vmul.f32 %v2457_v9, %v382_v10  ;;  %v2089_v57 = vpack.i.bf16 %v882_v49, %v914_v51  ;;  %v378_v9 = vld [vmem:[%s2258_s14 + $0x118] sm:$0xff] }
 0x105   : > { %v826_v62 = vmul.f32 %v2397_v60, %v378_v9  ;;  %v866_v60 = vld [vmem:[%s2253_s11 + $0x38] sm:$0xff]  ;;  %v919_v9 = vld [vmem:[%s2253_s11 + $0x1e0] sm:$0xff] }
 0x106   : > { %1094 = vmatpush.msra.mxu1 %v808_v14  ;;  %v2469_v35 = vpop.permute.xlu2 %738  ;;  %v829_v14 = vmul.f32 %v2406_v6, %v381_v11  ;;  %v377_v6 = vld [vmem:[%s2258_s14 + $0x110] sm:$0xff]  ;;  %v918_v10 = vld [vmem:[%s2253_s11 + $0x1d8] sm:$0xff] }
 0x107   : > { %v689_v20 = vpop.permute.xlu1 %688  ;;  %v684_v21 = vpop.permute.xlu0 %683  ;;  %v402_v38 = vld [vmem:[%s2258_s14 + $0x1d8] sm:$0xff] }
 0x108   : > { %1095 = vmatpush.msra.mxu1 %v807_v16  ;;  %v834_v56 = vmul.f32 %v689_v20, %v386_v41  ;;  %v833_v3 = vmul.f32 %v684_v21, %v385_v46  ;;  %v865_v16 = vld [vmem:[%s2253_s11 + $0x30] sm:$0xff]  ;;  %v827_v20 = vmul.f32 %v2439_v55, %v379_v15  ;;  %v883_v21 = vld [vmem:[%s2253_s11 + $0xc0] sm:$0xff]  ;;  %v825_v55 = vmul.f32 %v2423_v28, %v377_v6  ;;  %v916_v28 = vld [vmem:[%s2253_s11 + $0x1c8] sm:$0xff] }
 0x109   : > { %v867_v41 = vld [vmem:[%s2253_s11 + $0x40] sm:$0xff] }
 0x10a   : > { %2028 = vxpose.xlu1.b32.cont [3/16] (narrow) %v2027_v18, 32  ;;  %v897_v18 = vld [vmem:[%s2253_s11 + $0x130] sm:$0xff] }
 0x10b   : > { %2084 = vxpose.xlu2.b32.cont [5/16] (narrow) %v2083_v22, 32  ;;  %v915_v22 = vld [vmem:[%s2253_s11 + $0x1c0] sm:$0xff]  ;;  %v2035_v23 = vpack.i.bf16 %v897_v18, %v865_v16  ;;  %v398_v16 = vld [vmem:[%s2258_s14 + $0x1b8] sm:$0xff] }
 0x10e   : > { %v2476_v27 = vpop.permute.xlu2 %753 }
 0x10f   : > { %v704_v31 = vpop.permute.xlu1 %703  ;;  %v699_v32 = vpop.permute.xlu0 %698  ;;  %v847_v18 = vmul.f32 %v2476_v27, %v399_v4  ;;  %v902_v27 = vld [vmem:[%s2253_s11 + $0x158] sm:$0xff] }
 0x110   : > { %v837_v37 = vmul.f32 %v704_v31, %v389_v19  ;;  %v836_v40 = vmul.f32 %v699_v32, %v388_v33  ;;  %v2091_v19 = vpack.i.bf16 %v883_v21, %v915_v22  ;;  %v824_v31 = vmul.f32 %v2425_v29, %v376_v54  ;;  %v898_v32 = vld [vmem:[%s2253_s11 + $0x138] sm:$0xff]  ;;  %v397_v21 = vld [vmem:[%s2258_s14 + $0x1b0] sm:$0xff]  ;;  %v395_v54 = vld [vmem:[%s2258_s14 + $0x1a0] sm:$0xff] }
 0x112   : > { %2030 = vxpose.xlu1.b32.cont [4/16] (narrow) %v2029_v30, 32  ;;  %1110 = vmatpush.msra.mxu2 %v837_v37  ;;  %v375_v30 = vld [vmem:[%s2258_s14 + $0x100] sm:$0xff]  ;;  %v2037_v37 = vpack.i.bf16 %v898_v32, %v866_v60  ;;  %v393_v32 = vld [vmem:[%s2258_s14 + $0x190] sm:$0xff] }
 0x113   : > { %2086 = vxpose.xlu2.b32.cont [6/16] (narrow) %v2085_v36, 32  ;;  %v823_v33 = vmul.f32 %v2384_v47, %v375_v30  ;;  %v884_v36 = vld [vmem:[%s2253_s11 + $0xc8] sm:$0xff]  ;;  %v2039_v47 = vpack.i.bf16 %v899_v43, %v867_v41 }
 0x114   : > { %1111 = vmatpush.msra.mxu2 %v836_v40  ;;  %v2093_v40 = vpack.i.bf16 %v884_v36, %v916_v28  ;;  %v888_v30 = vld [vmem:[%s2253_s11 + $0xe8] sm:$0xff] }
 0x115   : > { %v392_v28 = vld [vmem:[%s2258_s14 + $0x188] sm:$0xff] }
 0x116   : > { %1112 = vmatpush.msra.mxu2 %v835_v45  ;;  %v789_v59 = vpop.permute.xlu2 %788  ;;  %v917_v45 = vld [vmem:[%s2253_s11 + $0x1d0] sm:$0xff] }
 0x117   : > { %v2489_v63 = vpop.permute.xlu1 %718  ;;  %v2491_v0 = vpop.permute.xlu0 %713  ;;  %v854_v25 = vmul.f32 %v789_v59, %v406_v50  ;;  %v405_v50 = vld [vmem:[%s2258_s14 + $0x1f0] sm:$0xff] }
 0x118   : > { %1113 = vmatpush.msra.mxu2 %v834_v56  ;;  %v2095_v56 = vpack.i.bf16 %v885_v44, %v917_v45  ;;  %v872_v44 = vld [vmem:[%s2253_s11 + $0x68] sm:$0xff] }
 0x119   : > { %1138 = vmatpush.msra.mxu3 %v854_v25  ;;  %v904_v45 = vld [vmem:[%s2253_s11 + $0x168] sm:$0xff] }
 0x11a   : > { %2032 = vxpose.xlu1.b32.cont [5/16] (narrow) %v2031_v61, 32  ;;  %1114 = vmatpush.msra.mxu2 %v833_v3  ;;  %v900_v3 = vld [vmem:[%s2253_s11 + $0x148] sm:$0xff] }
 0x11b   : > { %2088 = vxpose.xlu2.b32.cont [7/16] (narrow) %v2087_v2, 32  ;;  %v868_v2 = vld [vmem:[%s2253_s11 + $0x48] sm:$0xff] }
 0x11c   : > { %1115 = vmatpush.msra.mxu2 %v832_v5  ;;  %v886_v5 = vld [vmem:[%s2253_s11 + $0xd8] sm:$0xff]  ;;  %v2041_v7 = vpack.i.bf16 %v900_v3, %v868_v2 }
 0x11d   : > { %v2097_v51 = vpack.i.bf16 %v886_v5, %v918_v10 }
 0x11e   : > { %1116 = vmatpush.msra.mxu2 %v831_v8  ;;  %v774_v61 = vpop.permute.xlu2 %773  ;;  %v401_v8 = vld [vmem:[%s2258_s14 + $0x1d0] sm:$0xff] }
 0x11f   : > { %v2504_v52 = vpop.permute.xlu1 %733  ;;  %v2506_v13 = vpop.permute.xlu0 %728  ;;  %v851_v42 = vmul.f32 %v774_v61, %v403_v1 }
 0x120   : > { %1117 = vmatpush.msra.mxu2 %v830_v12  ;;  %v400_v12 = vld [vmem:[%s2258_s14 + $0x1c8] sm:$0xff]  ;;  %v843_v60 = vmul.f32 %v2504_v52, %v395_v54  ;;  %v903_v52 = vld [vmem:[%s2253_s11 + $0x160] sm:$0xff] }
 0x122   : > { %2034 = vxpose.xlu1.b32.cont [6/16] (narrow) %v2033_v58, 32  ;;  %1118 = vmatpush.msra.mxu2 %v829_v14  ;;  %v901_v14 = vld [vmem:[%s2253_s11 + $0x150] sm:$0xff] }
 0x123   : > { %2090 = vxpose.xlu2.b32.cont [8/16] (narrow) %v2089_v57, 32  ;;  %v869_v57 = vld [vmem:[%s2253_s11 + $0x50] sm:$0xff] }
 0x124   : > { %1119 = vmatpush.msra.mxu2 %v828_v34  ;;  %v887_v34 = vld [vmem:[%s2253_s11 + $0xe0] sm:$0xff] }
 0x125   : > { %v2099_v22 = vpack.i.bf16 %v887_v34, %v919_v9 }
 0x126   : > { %1120 = vmatpush.msra.mxu2 %v827_v20  ;;  %v2043_v20 = vpack.i.bf16 %v901_v14, %v869_v57 }
 0x127   : > { %v2520_v24 = vpop.permute.xlu1 %748  ;;  %v2522_v26 = vpop.permute.xlu0 %743 }
 0x128   : > { %1121 = vmatpush.msra.mxu2 %v826_v62  ;;  %v846_v6 = vmul.f32 %v2520_v24, %v398_v16  ;;  %v396_v62 = vld [vmem:[%s2258_s14 + $0x1a8] sm:$0xff] }
 0x129   : > { %v920_v24 = vld [vmem:[%s2253_s11 + $0x1e8] sm:$0xff] }
 0x12a   : > { %2036 = vxpose.xlu1.b32.cont [7/16] (narrow) %v2035_v23, 32  ;;  %1122 = vmatpush.msra.mxu2 %v825_v55  ;;  %v845_v23 = vmul.f32 %v2522_v26, %v397_v21  ;;  %v844_v55 = vmul.f32 %v2469_v35, %v396_v62  ;;  %v841_v35 = vmul.f32 %v2452_v48, %v393_v32 }
 0x12b   : > { %2092 = vxpose.xlu2.b32.cont [9/16] (narrow) %v2091_v19, 32  ;;  %v870_v19 = vld [vmem:[%s2253_s11 + $0x58] sm:$0xff] }
 0x12c   : > { %1123 = vmatpush.msra.mxu2 %v824_v31  ;;  %v394_v31 = vld [vmem:[%s2258_s14 + $0x198] sm:$0xff]  ;;  %v2045_v26 = vpack.i.bf16 %v902_v27, %v870_v19 }
 0x12d   : > { %v842_v36 = vmul.f32 %v2506_v13, %v394_v31  ;;  %v921_v13 = vld [vmem:[%s2253_s11 + $0x1f0] sm:$0xff] }
 0x12e   : > { %1124 = vmatpush.msra.mxu2 %v823_v33  ;;  %v2101_v33 = vpack.i.bf16 %v888_v30, %v920_v24 }
 0x12f   : > { %v764_v39 = vpop.permute.xlu1 %763  ;;  %v759_v29 = vpop.permute.xlu0 %758 }
 0x130   : > { %v849_v58 = vmul.f32 %v764_v39, %v401_v8  ;;  %v848_v15 = vmul.f32 %v759_v29, %v400_v12  ;;  %v871_v39 = vld [vmem:[%s2253_s11 + $0x60] sm:$0xff]  ;;  %v840_v29 = vmul.f32 %v2489_v63, %v392_v28  ;;  %v2049_v63 = vpack.i.bf16 %v904_v45, %v872_v44 }
 0x131   : > { %v2047_v48 = vpack.i.bf16 %v903_v52, %v871_v39  ;;  %v856_v28 = vld [vmem:[#allocation2] sm:$0xff] }
 0x132   : > { %2038 = vxpose.xlu1.b32.cont [8/16] (narrow) %v2037_v37, 32  ;;  %v391_v37 = vld [vmem:[%s2258_s14 + $0x180] sm:$0xff] }
 0x133   : > { %2094 = vxpose.xlu2.b32.cont [10/16] (narrow) %v2093_v40, 32  ;;  %v889_v40 = vld [vmem:[%s2253_s11 + $0xf0] sm:$0xff]  ;;  %v839_v41 = vmul.f32 %v2491_v0, %v391_v37  ;;  %v874_v0 = vld [vmem:[%s2253_s11 + $0x78] sm:$0xff] }
 0x134   : > { %v2103_v43 = vpack.i.bf16 %v889_v40, %v921_v13  ;;  %v857_v13 = vld [vmem:[#allocation2 + $0x18] sm:$0xff] }
 0x137   : > { %v779_v17 = vpop.permute.xlu1 %778  ;;  %v784_v46 = vpop.permute.xlu0 %783 }
 0x138   : > { %v853_v59 = vmul.f32 %v784_v46, %v405_v50  ;;  %v852_v25 = vmul.f32 %v779_v17, %v404_v53  ;;  %v890_v50 = vld [vmem:[%s2253_s11 + $0xf8] sm:$0xff]  ;;  %v873_v53 = vld [vmem:[%s2253_s11 + $0x70] sm:$0xff] }
 0x139   : > { %v905_v46 = vld [vmem:[%s2253_s11 + $0x170] sm:$0xff] }
 0x13a   : > { %2040 = vxpose.xlu1.b32.cont [9/16] (narrow) %v2039_v47, 32  ;;  %1139 = vmatpush.msra.mxu3 %v853_v59  ;;  %v922_v47 = vld [vmem:[%s2253_s11 + $0x1f8] sm:$0xff] }
 0x13b   : > { %2096 = vxpose.xlu2.b32.cont [11/16] (narrow) %v2095_v56, 32  ;;  %v2105_v17 = vpack.i.bf16 %v890_v50, %v922_v47  ;;  %v2051_v56 = vpack.i.bf16 %v905_v46, %v873_v53  ;;  %v906_v59 = vld [vmem:[%s2253_s11 + $0x178] sm:$0xff] }
 0x13c   : > { %1140 = vmatpush.msra.mxu3 %v852_v25  ;;  %v2053_v61 = vpack.i.bf16 %v906_v59, %v874_v0 }
 0x13e   : > { %1141 = vmatpush.msra.mxu3 %v851_v42 }
 0x13f   : > { %v769_v49 = vpop.permute.xlu0 %768 }
 0x140   : > { %v850_v11 = vmul.f32 %v769_v49, %v402_v38 }
 0x142   : > { %2042 = vxpose.xlu1.b32.cont [10/16] (narrow) %v2041_v7, 32  ;;  %1142 = vmatpush.msra.mxu3 %v850_v11 }
 0x143   : > { %2098 = vxpose.xlu2.b32.cont [12/16] (narrow) %v2097_v51, 32 }
 0x144   : > { %1143 = vmatpush.msra.mxu3 %v849_v58 }
 0x146   : > { %1144 = vmatpush.msra.mxu3 %v848_v15 }
 0x148   : > { %1145 = vmatpush.msra.mxu3 %v847_v18 }
 0x14a   : > { %2044 = vxpose.xlu1.b32.cont [11/16] (narrow) %v2043_v20, 32  ;;  %1146 = vmatpush.msra.mxu3 %v846_v6 }
 0x14b   : > { %2100 = vxpose.xlu2.b32.cont [13/16] (narrow) %v2099_v22, 32 }
 0x14c   : > { %1147 = vmatpush.msra.mxu3 %v845_v23 }
 0x14e   : > { %1148 = vmatpush.msra.mxu3 %v844_v55  ;;  %v855_v55 = vld [vmem:[#allocation2 + $0x10] sm:$0xff] }
 0x150   : > { %1149 = vmatpush.msra.mxu3 %v843_v60 }
 0x152   : > { %2046 = vxpose.xlu1.b32.cont [12/16] (narrow) %v2045_v26, 32  ;;  %1150 = vmatpush.msra.mxu3 %v842_v36 }
 0x153   : > { %2102 = vxpose.xlu2.b32.cont [14/16] (narrow) %v2101_v33, 32 }
 0x154   : > { %1151 = vmatpush.msra.mxu3 %v841_v35 }
 0x156   : > { %1152 = vmatpush.msra.mxu3 %v840_v29 }
 0x158   : > { %1153 = vmatpush.msra.mxu3 %v839_v41 }
 0x15a   : > { %2048 = vxpose.xlu1.b32.cont [13/16] (narrow) %v2047_v48, 32 }
 0x15b   : > { %2104 = vxpose.xlu2.b32.cont [15/16] (narrow) %v2103_v43, 32 }
 0x162   : > { %2050 = vxpose.xlu1.b32.cont [14/16] (narrow) %v2049_v63, 32 }
 0x163   : > { %2106 = vxpose.xlu2.b32.end [16/16] (narrow) %v2105_v17, 32  ;;  %v858_v17 = vld [vmem:[#allocation2 + $0x8] sm:$0xff] }
 0x16a   : > { %2052 = vxpose.xlu1.b32.cont [15/16] (narrow) %v2051_v56, 32 }
 0x172   : > { %2054 = vxpose.xlu1.b32.end [16/16] (narrow) %v2053_v61, 32 }
 0x184   : > { %v2107_v1 = vpop.trf.xlu2 }
 0x185   : > { %v2111_v25 = vunpack.i.h.bf16 %v2107_v1  ;;  %v2108_v2 = vunpack.i.l.bf16 %v2107_v1 }
 0x187   : > { %1096 = vmatmul.f32.vlgmr.msra.gmra.mxu1 %v2111_v25  ;;  %1154 = vmatmul.f32.vlgmr.msra.gmra.mxu3 %v2108_v2 }
 0x18c   : > { %v2112_v3 = vpop.trf.xlu2 }
 0x18d   : > { %v2116_v42 = vunpack.i.h.bf16 %v2112_v3  ;;  %v2113_v5 = vunpack.i.l.bf16 %v2112_v3 }
 0x18f   : > { %1099 = vmatmul.f32.gmra.mxu1 %v2116_v42  ;;  %1157 = vmatmul.f32.gmra.mxu3 %v2113_v5 }
 0x194   : > { %v2117_v10 = vpop.trf.xlu2 }
 0x195   : > { %v2121_v38 = vunpack.i.h.bf16 %v2117_v10  ;;  %v2118_v7 = vunpack.i.l.bf16 %v2117_v10 }
 0x197   : > { %1102 = vmatmul.f32.gmra.mxu1 %v2121_v38  ;;  %1160 = vmatmul.f32.gmra.mxu3 %v2118_v7 }
 0x19c   : > { %v2122_v8 = vpop.trf.xlu2 }
 0x19d   : > { %v2126_v49 = vunpack.i.h.bf16 %v2122_v8  ;;  %v2123_v51 = vunpack.i.l.bf16 %v2122_v8 }
 0x19e   : > { %v2055_v11 = vpop.trf.xlu1 }
 0x19f   : > { %v2056_v12 = vunpack.i.l.bf16 %v2055_v11  ;;  %v2059_v58 = vunpack.i.h.bf16 %v2055_v11  ;;  %1105 = vmatmul.f32.gmra.mxu1 %v2126_v49  ;;  %1163 = vmatmul.f32.gmra.mxu3 %v2123_v51 }
 0x1a1   : > { %1067 = vmatmul.f32.vlgmr.msra.gmra.mxu0 %v2056_v12  ;;  %1125 = vmatmul.f32.vlgmr.msra.gmra.mxu2 %v2059_v58 }
 0x1a6   : > { %v2060_v4 = vpop.trf.xlu1 }
 0x1a7   : > { %v2061_v57 = vunpack.i.l.bf16 %v2060_v4  ;;  %v2064_v14 = vunpack.i.h.bf16 %v2060_v4 }
 0x1a9   : > { %1070 = vmatmul.f32.gmra.mxu0 %v2061_v57  ;;  %1128 = vmatmul.f32.gmra.mxu2 %v2064_v14 }
 0x1ae   : > { %v2065_v15 = vpop.trf.xlu1 }
 0x1af   : > { %v2066_v34 = vunpack.i.l.bf16 %v2065_v15  ;;  %v2069_v9 = vunpack.i.h.bf16 %v2065_v15 }
 0x1b1   : > { %1073 = vmatmul.f32.gmra.mxu0 %v2066_v34  ;;  %1131 = vmatmul.f32.gmra.mxu2 %v2069_v9 }
 0x1b6   : > { %v2070_v16 = vpop.trf.xlu1 }
 0x1b7   : > { %v2071_v18 = vunpack.i.l.bf16 %v2070_v16  ;;  %v2074_v20 = vunpack.i.h.bf16 %v2070_v16 }
 0x1b9   : > { %1076 = vmatmul.f32.gmra.mxu0 %v2071_v18  ;;  %1134 = vmatmul.f32.gmra.mxu2 %v2074_v20 }
 0x204   : > { %v1097_v21 = vpop.f32.mrf.mxu1 }
 0x20a   : > { %v1155_v6 = vpop.f32.mrf.mxu3 }
 0x20c   : > { %v1100_v54 = vpop.f32.mrf.mxu1 }
 0x212   : > { %v1158_v24 = vpop.f32.mrf.mxu3 }
 0x214   : > { %v1103_v36 = vpop.f32.mrf.mxu1 }
 0x21a   : > { %v1161_v39 = vpop.f32.mrf.mxu3 }
 0x21c   : > { %v1106_v43 = vpop.f32.mrf.mxu1 }
 0x21e   : > { %v1068_v22 = vpop.f32.mrf.mxu0 }
 0x21f   : > { %v1098_v62 = vadd.f32 %v1097_v21, %v1068_v22 }
 0x222   : > { %v1164_v47 = vpop.f32.mrf.mxu3 }
 0x224   : > { %v1126_v23 = vpop.f32.mrf.mxu2 }
 0x225   : > { %v1127_v19 = vadd.f32 %v1126_v23, %v1098_v62 }
 0x226   : > { %v1071_v27 = vpop.f32.mrf.mxu0 }
 0x227   : > { %v1156_v30 = vadd.f32 %v1155_v6, %v1127_v19  ;;  %v1101_v60 = vadd.f32 %v1100_v54, %v1071_v27 }
 0x229   : > { %v1167_v31 = vadd.f32 %v1156_v30, %v855_v55 }
 0x22b   : > { %1171 = vst [vmem:[#allocation2 + $0x10] sm:$0xff] %v1167_v31 }
 0x22c   : > { %v1129_v26 = vpop.f32.mrf.mxu2 }
 0x22d   : > { %v1130_v32 = vadd.f32 %v1129_v26, %v1101_v60 }
 0x22e   : > { %v1074_v33 = vpop.f32.mrf.mxu0 }
 0x22f   : > { %v1159_v35 = vadd.f32 %v1158_v24, %v1130_v32  ;;  %v1104_v52 = vadd.f32 %v1103_v36, %v1074_v33 }
 0x231   : > { %v1168_v37 = vadd.f32 %v1159_v35, %v856_v28 }
 0x233   : > { %1172 = vst [vmem:[#allocation2] sm:$0xff] %v1168_v37 }
 0x234   : > { %v1132_v29 = vpop.f32.mrf.mxu2 }
 0x235   : > { %v1133_v40 = vadd.f32 %v1132_v29, %v1104_v52 }
 0x236   : > { %v1077_v48 = vpop.f32.mrf.mxu0 }
 0x237   : > { %v1162_v41 = vadd.f32 %v1161_v39, %v1133_v40  ;;  %v1107_v45 = vadd.f32 %v1106_v43, %v1077_v48 }
 0x239   : > { %v1169_v44 = vadd.f32 %v1162_v41, %v857_v13 }
 0x23b   : > { %1173 = vst [vmem:[#allocation2 + $0x18] sm:$0xff] %v1169_v44 }
 0x23c   : > { %v1135_v50 = vpop.f32.mrf.mxu2 }
 0x23d   : > { %v1136_v63 = vadd.f32 %v1135_v50, %v1107_v45 }
 0x23f   : > { %v1165_v53 = vadd.f32 %v1164_v47, %v1136_v63 }
 0x241   : > { %v1170_v46 = vadd.f32 %v1165_v53, %v858_v17 }
 0x243   : > { %1174 = vst [vmem:[#allocation2 + $0x8] sm:$0xff] %v1170_v46 }
 0x244 PF: > { %p1175_p10 = scmp.eq.s32.totalorder %s2163_s19, 1  ;;  %p1176_p11 = scmp.eq.s32.totalorder %s2159_s18, 0 }
 0x246   : > { %p1177_p12 = pnand %p1176_p11, %p1175_p10 }
 0x248   : > { %1180 = sbr.rel (%p1177_p12) target bundleno = 730 (0x2da), region = 52 }
 0x24d   : > { %v1186_v56 = vld [vmem:[%s2812_s3 + $0x10] sm:$0xff]  ;;  %v1184_v0 = vld [vmem:[%s2812_s3] sm:$0xff]  ;;  %v2179_v59 = vmov 0   ;;  %v1187_v25 = vld [vmem:[%s2812_s3 + $0x18] sm:$0xff] }
 0x24e   : > { %2128 = vset.pattern.permute.xlu1 %v2179_v59  ;;  %2127 = vset.pattern.permute.xlu0 %v2179_v59  ;;  %v1190_v61 = vsub.f32 0.0, %v1186_v56  ;;  %v1188_v1 = vsub.f32 0.0, %v1184_v0  ;;  %v1185_v2 = vld [vmem:[%s2812_s3 + $0x8] sm:$0xff]  ;;  %v1191_v3 = vsub.f32 0.0, %v1187_v25  ;;  %v1181_v5 = vld [vmem:[%s2813_s4] sm:$0x1] }
 0x24f   : > { %v1189_v42 = vsub.f32 0.0, %v1185_v2  ;;  %v1182_v10 = vand.u32 2147483647, %v1181_v5  ;;  %v1229_v14 = vld [vmem:[#allocation2 + $0x18] sm:$0xff]  ;;  %v1227_v9 = vld [vmem:[#allocation2 + $0x10] sm:$0xff]  ;;  %v1230_v62 = vld [vmem:[#allocation2 + $0x8] sm:$0xff] }
 0x250   : > { %1204 = vperm.xlu1 %2128, %v1190_v61   ;;  %1194 = vperm.xlu0 %2127, %v1188_v1   ;;  %v1228_v23 = vld [vmem:[#allocation2] sm:$0xff] }
 0x251   : > { %v1183_v38 = vmax.f32 %v1182_v10, 1e-08 }
 0x253   : > { %v1213_v7 = vperm.slane %v1183_v38, 0 }
 0x258   : > { %1209 = vperm.xlu1 %2128, %v1191_v3   ;;  %1199 = vperm.xlu0 %2127, %v1189_v42  }
 0x2c2   : > { %v1205_v8 = vpop.permute.xlu1 %1204  ;;  %v1195_v49 = vpop.permute.xlu0 %1194 }
 0x2c3   : > { %v1217_v51 = vmul.f32 %v1213_v7, %v1205_v8  ;;  %v1215_v11 = vmul.f32 %v1213_v7, %v1195_v49 }
 0x2c5   : > { %v1223_v12 = vmul.f32 1.442695, %v1217_v51  ;;  %v1219_v58 = vmul.f32 1.442695, %v1215_v11 }
 0x2c7   : > { %2129 = vpow2.f32 %v1223_v12 }
 0x2c8   : > { %2131 = vpow2.f32 %v1219_v58 }
 0x2ca   : > { %v1210_v4 = vpop.permute.xlu1 %1209  ;;  %v1200_v57 = vpop.permute.xlu0 %1199 }
 0x2cb   : > { %v1218_v15 = vmul.f32 %v1213_v7, %v1210_v4  ;;  %v1216_v34 = vmul.f32 %v1213_v7, %v1200_v57 }
 0x2cd   : > { %v2130_v16 = vpop.eup %2129  ;;  %v1225_v18 = vmul.f32 1.442695, %v1218_v15  ;;  %v1221_v20 = vmul.f32 1.442695, %v1216_v34 }
 0x2ce   : > { %v2132_v21 = vpop.eup %2131  ;;  %v1233_v22 = vmul.f32 %v2130_v16, %v1229_v14 }
 0x2cf   : > { %v1231_v6 = vmul.f32 %v2132_v21, %v1227_v9  ;;  %2133 = vpow2.f32 %v1225_v18 }
 0x2d0   : > { %1237 = vst [vmem:[#allocation3 + $0x8] sm:$0xff] %v1233_v22  ;;  %2135 = vpow2.f32 %v1221_v20 }
 0x2d1   : > { %1235 = vst [vmem:[#allocation3] sm:$0xff] %v1231_v6 }
 0x2d5   : > { %v2134_v54 = vpop.eup %2133 }
 0x2d6   : > { %v2136_v19 = vpop.eup %2135  ;;  %v1234_v27 = vmul.f32 %v2134_v54, %v1230_v62 }
 0x2d7   : > { %v1232_v55 = vmul.f32 %v2136_v19, %v1228_v23 }
 0x2d8   : > { %1238 = vst [vmem:[#allocation3 + $0x10] sm:$0xff] %v1234_v27 }
 0x2d9   : > { %1236 = vst [vmem:[#allocation3 + $0x18] sm:$0xff] %v1232_v55 }
 0x2da PF: > { %p1886_p13 = scmp.ne.s32.totalorder %s2163_s19, 1 }
 0x2dc   : > { %1241 = sbr.rel (%p1886_p13) target bundleno = 999 (0x3e7), region = 56 }
 0x2e1   : > { %v1309_v30 = vld [vmem:[#allocation3 + $0x10] sm:$0xff]  ;;  %v1308_v24 = vld [vmem:[#allocation3 + $0x8] sm:$0xff]  ;;  %v1307_v31 = vld [vmem:[#allocation3 + $0x18] sm:$0xff]  ;;  %vm1310_vm0 = vcmask 261120  }
 0x2e2   : > { %1954 = vmatpush.msra.mxu2 %v1309_v30  ;;  %1955 = vmatpush.msra.mxu3 %v1309_v30  ;;  %v1306_v60 = vld [vmem:[#allocation3] sm:$0xff]  ;;  %v1275_v28 = vld [vmem:[%s2253_s11 + $0x108] sm:$0xff]  ;;  %v1276_v52 = vld [vmem:[%s2253_s11 + $0x110] sm:$0xff] }
 0x2e3   : > { %1515 = vmatpush.msra.mxu0 %v1309_v30  ;;  %1953 = vmatpush.msra.mxu1 %v1309_v30  ;;  %v1274_v26 = vld [vmem:[%s2253_s11 + $0x100] sm:$0xff]  ;;  %v1291_v35 = vld [vmem:[%s2253_s11 + $0x188] sm:$0xff]  ;;  %v1292_v29 = vld [vmem:[%s2253_s11 + $0x190] sm:$0xff] }
 0x2e4   : > { %1957 = vmatpush.msra.mxu2 %v1308_v24  ;;  %1958 = vmatpush.msra.mxu3 %v1308_v24  ;;  %v1290_v32 = vld [vmem:[%s2253_s11 + $0x180] sm:$0xff]  ;;  %v1243_v37 = vld [vmem:[%s2253_s11 + $0x8] sm:$0xff]  ;;  %v1244_v40 = vld [vmem:[%s2253_s11 + $0x10] sm:$0xff] }
 0x2e5   : > { %1516 = vmatpush.msra.mxu0 %v1308_v24  ;;  %1956 = vmatpush.msra.mxu1 %v1308_v24  ;;  %v1242_v33 = vld [vmem:[%s2253_s11] sm:$0xff]  ;;  %v1259_v39 = vld [vmem:[%s2253_s11 + $0x88] sm:$0xff]  ;;  %v1260_v13 = vld [vmem:[%s2253_s11 + $0x90] sm:$0xff] }
 0x2e6   : > { %1960 = vmatpush.msra.mxu2 %v1307_v31  ;;  %1961 = vmatpush.msra.mxu3 %v1307_v31  ;;  %v1258_v36 = vld [vmem:[%s2253_s11 + $0x80] sm:$0xff]  ;;  %v1277_v41 = vld [vmem:[%s2253_s11 + $0x118] sm:$0xff]  ;;  %v1279_v17 = vld [vmem:[%s2253_s11 + $0x128] sm:$0xff] }
 0x2e7   : > { %1517 = vmatpush.msra.mxu0 %v1307_v31  ;;  %1959 = vmatpush.msra.mxu1 %v1307_v31  ;;  %v1293_v48 = vld [vmem:[%s2253_s11 + $0x198] sm:$0xff]  ;;  %v1278_v45 = vld [vmem:[%s2253_s11 + $0x120] sm:$0xff]  ;;  %v1295_v53 = vld [vmem:[%s2253_s11 + $0x1a8] sm:$0xff] }
 0x2e8   : > { %1963 = vmatpush.msra.mxu2 %v1306_v60  ;;  %1964 = vmatpush.msra.mxu3 %v1306_v60  ;;  %v1245_v43 = vld [vmem:[%s2253_s11 + $0x18] sm:$0xff]  ;;  %v1294_v50 = vld [vmem:[%s2253_s11 + $0x1a0] sm:$0xff]  ;;  %v1247_v46 = vld [vmem:[%s2253_s11 + $0x28] sm:$0xff] }
 0x2e9   : > { %1919 = vmatmul.msk.f32.vlgmr.msra.gmra.mxu2 %vm1310_vm0, %v1274_v26  ;;  %1935 = vmatmul.msk.f32.vlgmr.msra.gmra.mxu3 %vm1310_vm0, %v1290_v32  ;;  %v1261_v44 = vld [vmem:[%s2253_s11 + $0x98] sm:$0xff]  ;;  %v1246_v47 = vld [vmem:[%s2253_s11 + $0x20] sm:$0xff]  ;;  %v1263_v56 = vld [vmem:[%s2253_s11 + $0xa8] sm:$0xff] }
 0x2ea   : > { %1518 = vmatpush.msra.mxu0 %v1306_v60  ;;  %1962 = vmatpush.msra.mxu1 %v1306_v60  ;;  %v1262_v63 = vld [vmem:[%s2253_s11 + $0xa0] sm:$0xff]  ;;  %v1280_v0 = vld [vmem:[%s2253_s11 + $0x130] sm:$0xff]  ;;  %v1281_v25 = vld [vmem:[%s2253_s11 + $0x138] sm:$0xff] }
 0x2eb   : > { %1887 = vmatmul.msk.f32.vlgmr.msra.gmra.mxu0 %vm1310_vm0, %v1242_v33  ;;  %1903 = vmatmul.msk.f32.vlgmr.msra.gmra.mxu1 %vm1310_vm0, %v1258_v36  ;;  %v1296_v59 = vld [vmem:[%s2253_s11 + $0x1b0] sm:$0xff]  ;;  %v1297_v2 = vld [vmem:[%s2253_s11 + $0x1b8] sm:$0xff]  ;;  %v1282_v5 = vld [vmem:[%s2253_s11 + $0x140] sm:$0xff] }
 0x2ec   : > { %v1248_v61 = vld [vmem:[%s2253_s11 + $0x30] sm:$0xff]  ;;  %v1249_v3 = vld [vmem:[%s2253_s11 + $0x38] sm:$0xff]  ;;  %v1298_v10 = vld [vmem:[%s2253_s11 + $0x1c0] sm:$0xff] }
 0x2ed   : > { %v1264_v1 = vld [vmem:[%s2253_s11 + $0xb0] sm:$0xff]  ;;  %v1265_v42 = vld [vmem:[%s2253_s11 + $0xb8] sm:$0xff]  ;;  %v1250_v38 = vld [vmem:[%s2253_s11 + $0x40] sm:$0xff] }
 0x2ee   : > { %v1266_v7 = vld [vmem:[%s2253_s11 + $0xc0] sm:$0xff]  ;;  %v1283_v8 = vld [vmem:[%s2253_s11 + $0x148] sm:$0xff]  ;;  %v1284_v12 = vld [vmem:[%s2253_s11 + $0x150] sm:$0xff] }
 0x2ef   : > { %v1299_v49 = vld [vmem:[%s2253_s11 + $0x1c8] sm:$0xff]  ;;  %v1300_v58 = vld [vmem:[%s2253_s11 + $0x1d0] sm:$0xff]  ;;  %v1285_v14 = vld [vmem:[%s2253_s11 + $0x158] sm:$0xff] }
 0x2f0   : > { %v1251_v51 = vld [vmem:[%s2253_s11 + $0x48] sm:$0xff]  ;;  %v1252_v4 = vld [vmem:[%s2253_s11 + $0x50] sm:$0xff]  ;;  %v1301_v15 = vld [vmem:[%s2253_s11 + $0x1d8] sm:$0xff] }
 0x2f1   : > { %1920 = vmatmul.msk.f32.gmra.mxu2 %vm1310_vm0, %v1275_v28  ;;  %1936 = vmatmul.msk.f32.gmra.mxu3 %vm1310_vm0, %v1291_v35  ;;  %v1267_v11 = vld [vmem:[%s2253_s11 + $0xc8] sm:$0xff]  ;;  %v1268_v57 = vld [vmem:[%s2253_s11 + $0xd0] sm:$0xff]  ;;  %v1253_v34 = vld [vmem:[%s2253_s11 + $0x58] sm:$0xff] }
 0x2f2   : > { %v1269_v9 = vld [vmem:[%s2253_s11 + $0xd8] sm:$0xff]  ;;  %v1286_v16 = vld [vmem:[%s2253_s11 + $0x160] sm:$0xff]  ;;  %v1287_v22 = vld [vmem:[%s2253_s11 + $0x168] sm:$0xff] }
 0x2f3   : > { %1888 = vmatmul.msk.f32.gmra.mxu0 %vm1310_vm0, %v1243_v37  ;;  %1904 = vmatmul.msk.f32.gmra.mxu1 %vm1310_vm0, %v1259_v39  ;;  %v1302_v18 = vld [vmem:[%s2253_s11 + $0x1e0] sm:$0xff]  ;;  %v1303_v6 = vld [vmem:[%s2253_s11 + $0x1e8] sm:$0xff]  ;;  %v1288_v54 = vld [vmem:[%s2253_s11 + $0x170] sm:$0xff] }
 0x2f4   : > { %v1254_v20 = vld [vmem:[%s2253_s11 + $0x60] sm:$0xff]  ;;  %v1255_v62 = vld [vmem:[%s2253_s11 + $0x68] sm:$0xff]  ;;  %v1304_v19 = vld [vmem:[%s2253_s11 + $0x1f0] sm:$0xff] }
 0x2f5   : > { %v1270_v21 = vld [vmem:[%s2253_s11 + $0xe0] sm:$0xff]  ;;  %v1271_v23 = vld [vmem:[%s2253_s11 + $0xe8] sm:$0xff]  ;;  %v1256_v27 = vld [vmem:[%s2253_s11 + $0x70] sm:$0xff] }
 0x2f6   : > { %v1272_v55 = vld [vmem:[%s2253_s11 + $0xf0] sm:$0xff]  ;;  %v1289_v30 = vld [vmem:[%s2253_s11 + $0x178] sm:$0xff] }
 0x2f7   : > { %v1305_v24 = vld [vmem:[%s2253_s11 + $0x1f8] sm:$0xff] }
 0x2f8   : > { %v1257_v31 = vld [vmem:[%s2253_s11 + $0x78] sm:$0xff] }
 0x2f9   : > { %1921 = vmatmul.msk.f32.gmra.mxu2 %vm1310_vm0, %v1276_v52  ;;  %1937 = vmatmul.msk.f32.gmra.mxu3 %vm1310_vm0, %v1292_v29  ;;  %v1273_v60 = vld [vmem:[%s2253_s11 + $0xf8] sm:$0xff] }
 0x2fb   : > { %1889 = vmatmul.msk.f32.gmra.mxu0 %vm1310_vm0, %v1244_v40  ;;  %1905 = vmatmul.msk.f32.gmra.mxu1 %vm1310_vm0, %v1260_v13 }
 0x301   : > { %1922 = vmatmul.msk.f32.gmra.mxu2 %vm1310_vm0, %v1277_v41  ;;  %1938 = vmatmul.msk.f32.gmra.mxu3 %vm1310_vm0, %v1293_v48 }
 0x303   : > { %1890 = vmatmul.msk.f32.gmra.mxu0 %vm1310_vm0, %v1245_v43  ;;  %1906 = vmatmul.msk.f32.gmra.mxu1 %vm1310_vm0, %v1261_v44 }
 0x309   : > { %1923 = vmatmul.msk.f32.gmra.mxu2 %vm1310_vm0, %v1278_v45  ;;  %1939 = vmatmul.msk.f32.gmra.mxu3 %vm1310_vm0, %v1294_v50 }
 0x30b   : > { %1891 = vmatmul.msk.f32.gmra.mxu0 %vm1310_vm0, %v1246_v47  ;;  %1907 = vmatmul.msk.f32.gmra.mxu1 %vm1310_vm0, %v1262_v63 }
 0x311   : > { %1924 = vmatmul.msk.f32.gmra.mxu2 %vm1310_vm0, %v1279_v17  ;;  %1940 = vmatmul.msk.f32.gmra.mxu3 %vm1310_vm0, %v1295_v53 }
 0x313   : > { %1892 = vmatmul.msk.f32.gmra.mxu0 %vm1310_vm0, %v1247_v46  ;;  %1908 = vmatmul.msk.f32.gmra.mxu1 %vm1310_vm0, %v1263_v56 }
 0x319   : > { %1925 = vmatmul.msk.f32.gmra.mxu2 %vm1310_vm0, %v1280_v0  ;;  %1941 = vmatmul.msk.f32.gmra.mxu3 %vm1310_vm0, %v1296_v59 }
 0x31b   : > { %1893 = vmatmul.msk.f32.gmra.mxu0 %vm1310_vm0, %v1248_v61  ;;  %1909 = vmatmul.msk.f32.gmra.mxu1 %vm1310_vm0, %v1264_v1 }
 0x321   : > { %1926 = vmatmul.msk.f32.gmra.mxu2 %vm1310_vm0, %v1281_v25  ;;  %1942 = vmatmul.msk.f32.gmra.mxu3 %vm1310_vm0, %v1297_v2 }
 0x323   : > { %1894 = vmatmul.msk.f32.gmra.mxu0 %vm1310_vm0, %v1249_v3  ;;  %1910 = vmatmul.msk.f32.gmra.mxu1 %vm1310_vm0, %v1265_v42 }
 0x329   : > { %1927 = vmatmul.msk.f32.gmra.mxu2 %vm1310_vm0, %v1282_v5  ;;  %1943 = vmatmul.msk.f32.gmra.mxu3 %vm1310_vm0, %v1298_v10 }
 0x32b   : > { %1895 = vmatmul.msk.f32.gmra.mxu0 %vm1310_vm0, %v1250_v38  ;;  %1911 = vmatmul.msk.f32.gmra.mxu1 %vm1310_vm0, %v1266_v7 }
 0x331   : > { %1928 = vmatmul.msk.f32.gmra.mxu2 %vm1310_vm0, %v1283_v8  ;;  %1944 = vmatmul.msk.f32.gmra.mxu3 %vm1310_vm0, %v1299_v49 }
 0x333   : > { %1896 = vmatmul.msk.f32.gmra.mxu0 %vm1310_vm0, %v1251_v51  ;;  %1912 = vmatmul.msk.f32.gmra.mxu1 %vm1310_vm0, %v1267_v11 }
 0x339   : > { %1929 = vmatmul.msk.f32.gmra.mxu2 %vm1310_vm0, %v1284_v12  ;;  %1945 = vmatmul.msk.f32.gmra.mxu3 %vm1310_vm0, %v1300_v58 }
 0x33b   : > { %1897 = vmatmul.msk.f32.gmra.mxu0 %vm1310_vm0, %v1252_v4  ;;  %1913 = vmatmul.msk.f32.gmra.mxu1 %vm1310_vm0, %v1268_v57 }
 0x341   : > { %1930 = vmatmul.msk.f32.gmra.mxu2 %vm1310_vm0, %v1285_v14  ;;  %1946 = vmatmul.msk.f32.gmra.mxu3 %vm1310_vm0, %v1301_v15 }
 0x343   : > { %1898 = vmatmul.msk.f32.gmra.mxu0 %vm1310_vm0, %v1253_v34  ;;  %1914 = vmatmul.msk.f32.gmra.mxu1 %vm1310_vm0, %v1269_v9 }
 0x349   : > { %1931 = vmatmul.msk.f32.gmra.mxu2 %vm1310_vm0, %v1286_v16  ;;  %1947 = vmatmul.msk.f32.gmra.mxu3 %vm1310_vm0, %v1302_v18 }
 0x34b   : > { %1899 = vmatmul.msk.f32.gmra.mxu0 %vm1310_vm0, %v1254_v20  ;;  %1915 = vmatmul.msk.f32.gmra.mxu1 %vm1310_vm0, %v1270_v21 }
 0x351   : > { %1932 = vmatmul.msk.f32.gmra.mxu2 %vm1310_vm0, %v1287_v22  ;;  %1948 = vmatmul.msk.f32.gmra.mxu3 %vm1310_vm0, %v1303_v6 }
 0x353   : > { %1900 = vmatmul.msk.f32.gmra.mxu0 %vm1310_vm0, %v1255_v62  ;;  %1916 = vmatmul.msk.f32.gmra.mxu1 %vm1310_vm0, %v1271_v23 }
 0x359   : > { %1933 = vmatmul.msk.f32.gmra.mxu2 %vm1310_vm0, %v1288_v54  ;;  %1949 = vmatmul.msk.f32.gmra.mxu3 %vm1310_vm0, %v1304_v19 }
 0x35b   : > { %1901 = vmatmul.msk.f32.gmra.mxu0 %vm1310_vm0, %v1256_v27  ;;  %1917 = vmatmul.msk.f32.gmra.mxu1 %vm1310_vm0, %v1272_v55 }
 0x361   : > { %1934 = vmatmul.msk.f32.gmra.mxu2 %vm1310_vm0, %v1289_v30  ;;  %1950 = vmatmul.msk.f32.gmra.mxu3 %vm1310_vm0, %v1305_v24 }
 0x363   : > { %1902 = vmatmul.msk.f32.gmra.mxu0 %vm1310_vm0, %v1257_v31  ;;  %1918 = vmatmul.msk.f32.gmra.mxu1 %vm1310_vm0, %v1273_v60 }
 0x368   : > { %v1520_v26 = vpop.f32.mrf.mxu0  ;;  %v1568_v32 = vpop.f32.mrf.mxu1 }
 0x369   : > { %1712 = vst [vmem:[%s2268_s28] sm:$0xff] %v1520_v26 }
 0x36a   : > { %1728 = vst [vmem:[%s2268_s28 + $0x80] sm:$0xff] %v1568_v32 }
 0x36c   : > { %v1616_v33 = vpop.f32.mrf.mxu2  ;;  %v1664_v36 = vpop.f32.mrf.mxu3 }
 0x36d   : > { %1744 = vst [vmem:[%s2268_s28 + $0x100] sm:$0xff] %v1616_v33 }
 0x36e   : > { %1760 = vst [vmem:[%s2268_s28 + $0x180] sm:$0xff] %v1664_v36 }
 0x370   : > { %v1523_v28 = vpop.f32.mrf.mxu0  ;;  %v1571_v35 = vpop.f32.mrf.mxu1 }
 0x371   : > { %1713 = vst [vmem:[%s2268_s28 + $0x8] sm:$0xff] %v1523_v28 }
 0x372   : > { %1729 = vst [vmem:[%s2268_s28 + $0x88] sm:$0xff] %v1571_v35 }
 0x374   : > { %v1619_v37 = vpop.f32.mrf.mxu2  ;;  %v1667_v39 = vpop.f32.mrf.mxu3 }
 0x375   : > { %1745 = vst [vmem:[%s2268_s28 + $0x108] sm:$0xff] %v1619_v37 }
 0x376   : > { %1761 = vst [vmem:[%s2268_s28 + $0x188] sm:$0xff] %v1667_v39 }
 0x378   : > { %v1526_v52 = vpop.f32.mrf.mxu0  ;;  %v1574_v29 = vpop.f32.mrf.mxu1 }
 0x379   : > { %1714 = vst [vmem:[%s2268_s28 + $0x10] sm:$0xff] %v1526_v52 }
 0x37a   : > { %1730 = vst [vmem:[%s2268_s28 + $0x90] sm:$0xff] %v1574_v29 }
 0x37c   : > { %v1622_v40 = vpop.f32.mrf.mxu2  ;;  %v1670_v13 = vpop.f32.mrf.mxu3 }
 0x37d   : > { %1746 = vst [vmem:[%s2268_s28 + $0x110] sm:$0xff] %v1622_v40 }
 0x37e   : > { %1762 = vst [vmem:[%s2268_s28 + $0x190] sm:$0xff] %v1670_v13 }
 0x380   : > { %v1529_v41 = vpop.f32.mrf.mxu0  ;;  %v1577_v48 = vpop.f32.mrf.mxu1 }
 0x381   : > { %1715 = vst [vmem:[%s2268_s28 + $0x18] sm:$0xff] %v1529_v41 }
 0x382   : > { %1731 = vst [vmem:[%s2268_s28 + $0x98] sm:$0xff] %v1577_v48 }
 0x384   : > { %v1625_v43 = vpop.f32.mrf.mxu2  ;;  %v1673_v44 = vpop.f32.mrf.mxu3 }
 0x385   : > { %1747 = vst [vmem:[%s2268_s28 + $0x118] sm:$0xff] %v1625_v43 }
 0x386   : > { %1763 = vst [vmem:[%s2268_s28 + $0x198] sm:$0xff] %v1673_v44 }
 0x388   : > { %v1532_v45 = vpop.f32.mrf.mxu0  ;;  %v1580_v50 = vpop.f32.mrf.mxu1 }
 0x389   : > { %1716 = vst [vmem:[%s2268_s28 + $0x20] sm:$0xff] %v1532_v45 }
 0x38a   : > { %1732 = vst [vmem:[%s2268_s28 + $0xa0] sm:$0xff] %v1580_v50 }
 0x38c   : > { %v1628_v47 = vpop.f32.mrf.mxu2  ;;  %v1676_v63 = vpop.f32.mrf.mxu3 }
 0x38d   : > { %1748 = vst [vmem:[%s2268_s28 + $0x120] sm:$0xff] %v1628_v47 }
 0x38e   : > { %1764 = vst [vmem:[%s2268_s28 + $0x1a0] sm:$0xff] %v1676_v63 }
 0x390   : > { %v1535_v17 = vpop.f32.mrf.mxu0  ;;  %v1583_v53 = vpop.f32.mrf.mxu1 }
 0x391   : > { %1717 = vst [vmem:[%s2268_s28 + $0x28] sm:$0xff] %v1535_v17 }
 0x392   : > { %1733 = vst [vmem:[%s2268_s28 + $0xa8] sm:$0xff] %v1583_v53 }
 0x394   : > { %v1631_v46 = vpop.f32.mrf.mxu2  ;;  %v1679_v56 = vpop.f32.mrf.mxu3 }
 0x395   : > { %1749 = vst [vmem:[%s2268_s28 + $0x128] sm:$0xff] %v1631_v46 }
 0x396   : > { %1765 = vst [vmem:[%s2268_s28 + $0x1a8] sm:$0xff] %v1679_v56 }
 0x398   : > { %v1538_v0 = vpop.f32.mrf.mxu0  ;;  %v1586_v59 = vpop.f32.mrf.mxu1 }
 0x399   : > { %1718 = vst [vmem:[%s2268_s28 + $0x30] sm:$0xff] %v1538_v0 }
 0x39a   : > { %1734 = vst [vmem:[%s2268_s28 + $0xb0] sm:$0xff] %v1586_v59 }
 0x39c   : > { %v1634_v61 = vpop.f32.mrf.mxu2  ;;  %v1682_v1 = vpop.f32.mrf.mxu3 }
 0x39d   : > { %1750 = vst [vmem:[%s2268_s28 + $0x130] sm:$0xff] %v1634_v61 }
 0x39e   : > { %1766 = vst [vmem:[%s2268_s28 + $0x1b0] sm:$0xff] %v1682_v1 }
 0x3a0   : > { %v1541_v25 = vpop.f32.mrf.mxu0  ;;  %v1589_v2 = vpop.f32.mrf.mxu1 }
 0x3a1   : > { %1719 = vst [vmem:[%s2268_s28 + $0x38] sm:$0xff] %v1541_v25 }
 0x3a2   : > { %1735 = vst [vmem:[%s2268_s28 + $0xb8] sm:$0xff] %v1589_v2 }
 0x3a4   : > { %v1637_v3 = vpop.f32.mrf.mxu2  ;;  %v1685_v42 = vpop.f32.mrf.mxu3 }
 0x3a5   : > { %1751 = vst [vmem:[%s2268_s28 + $0x138] sm:$0xff] %v1637_v3 }
 0x3a6   : > { %1767 = vst [vmem:[%s2268_s28 + $0x1b8] sm:$0xff] %v1685_v42 }
 0x3a8   : > { %v1544_v5 = vpop.f32.mrf.mxu0  ;;  %v1592_v10 = vpop.f32.mrf.mxu1 }
 0x3a9   : > { %1720 = vst [vmem:[%s2268_s28 + $0x40] sm:$0xff] %v1544_v5 }
 0x3aa   : > { %1736 = vst [vmem:[%s2268_s28 + $0xc0] sm:$0xff] %v1592_v10 }
 0x3ac   : > { %v1640_v38 = vpop.f32.mrf.mxu2  ;;  %v1688_v7 = vpop.f32.mrf.mxu3 }
 0x3ad   : > { %1752 = vst [vmem:[%s2268_s28 + $0x140] sm:$0xff] %v1640_v38 }
 0x3ae   : > { %1768 = vst [vmem:[%s2268_s28 + $0x1c0] sm:$0xff] %v1688_v7 }
 0x3b0   : > { %v1547_v8 = vpop.f32.mrf.mxu0  ;;  %v1595_v49 = vpop.f32.mrf.mxu1 }
 0x3b1   : > { %1721 = vst [vmem:[%s2268_s28 + $0x48] sm:$0xff] %v1547_v8 }
 0x3b2   : > { %1737 = vst [vmem:[%s2268_s28 + $0xc8] sm:$0xff] %v1595_v49 }
 0x3b4   : > { %v1643_v51 = vpop.f32.mrf.mxu2  ;;  %v1691_v11 = vpop.f32.mrf.mxu3 }
 0x3b5   : > { %1753 = vst [vmem:[%s2268_s28 + $0x148] sm:$0xff] %v1643_v51 }
 0x3b6   : > { %1769 = vst [vmem:[%s2268_s28 + $0x1c8] sm:$0xff] %v1691_v11 }
 0x3b8   : > { %v1550_v12 = vpop.f32.mrf.mxu0  ;;  %v1598_v58 = vpop.f32.mrf.mxu1 }
 0x3b9   : > { %1722 = vst [vmem:[%s2268_s28 + $0x50] sm:$0xff] %v1550_v12 }
 0x3ba   : > { %1738 = vst [vmem:[%s2268_s28 + $0xd0] sm:$0xff] %v1598_v58 }
 0x3bc   : > { %v1646_v4 = vpop.f32.mrf.mxu2  ;;  %v1694_v57 = vpop.f32.mrf.mxu3 }
 0x3bd   : > { %1754 = vst [vmem:[%s2268_s28 + $0x150] sm:$0xff] %v1646_v4 }
 0x3be   : > { %1770 = vst [vmem:[%s2268_s28 + $0x1d0] sm:$0xff] %v1694_v57 }
 0x3c0   : > { %v1553_v14 = vpop.f32.mrf.mxu0  ;;  %v1601_v15 = vpop.f32.mrf.mxu1 }
 0x3c1   : > { %1723 = vst [vmem:[%s2268_s28 + $0x58] sm:$0xff] %v1553_v14 }
 0x3c2   : > { %1739 = vst [vmem:[%s2268_s28 + $0xd8] sm:$0xff] %v1601_v15 }
 0x3c4   : > { %v1649_v34 = vpop.f32.mrf.mxu2  ;;  %v1697_v9 = vpop.f32.mrf.mxu3 }
 0x3c5   : > { %1755 = vst [vmem:[%s2268_s28 + $0x158] sm:$0xff] %v1649_v34 }
 0x3c6   : > { %1771 = vst [vmem:[%s2268_s28 + $0x1d8] sm:$0xff] %v1697_v9 }
 0x3c8   : > { %v1556_v16 = vpop.f32.mrf.mxu0  ;;  %v1604_v18 = vpop.f32.mrf.mxu1 }
 0x3c9   : > { %1724 = vst [vmem:[%s2268_s28 + $0x60] sm:$0xff] %v1556_v16 }
 0x3ca   : > { %1740 = vst [vmem:[%s2268_s28 + $0xe0] sm:$0xff] %v1604_v18 }
 0x3cc   : > { %v1652_v20 = vpop.f32.mrf.mxu2  ;;  %v1700_v21 = vpop.f32.mrf.mxu3 }
 0x3cd   : > { %1756 = vst [vmem:[%s2268_s28 + $0x160] sm:$0xff] %v1652_v20 }
 0x3ce   : > { %1772 = vst [vmem:[%s2268_s28 + $0x1e0] sm:$0xff] %v1700_v21 }
 0x3d0   : > { %v1559_v22 = vpop.f32.mrf.mxu0  ;;  %v1607_v6 = vpop.f32.mrf.mxu1 }
 0x3d1   : > { %1725 = vst [vmem:[%s2268_s28 + $0x68] sm:$0xff] %v1559_v22 }
 0x3d2   : > { %1741 = vst [vmem:[%s2268_s28 + $0xe8] sm:$0xff] %v1607_v6 }
 0x3d4   : > { %v1655_v62 = vpop.f32.mrf.mxu2  ;;  %v1703_v23 = vpop.f32.mrf.mxu3 }
 0x3d5   : > { %1757 = vst [vmem:[%s2268_s28 + $0x168] sm:$0xff] %v1655_v62 }
 0x3d6   : > { %1773 = vst [vmem:[%s2268_s28 + $0x1e8] sm:$0xff] %v1703_v23 }
 0x3d8   : > { %v1562_v54 = vpop.f32.mrf.mxu0  ;;  %v1610_v19 = vpop.f32.mrf.mxu1 }
 0x3d9   : > { %1726 = vst [vmem:[%s2268_s28 + $0x70] sm:$0xff] %v1562_v54 }
 0x3da   : > { %1742 = vst [vmem:[%s2268_s28 + $0xf0] sm:$0xff] %v1610_v19 }
 0x3dc   : > { %v1658_v27 = vpop.f32.mrf.mxu2  ;;  %v1706_v55 = vpop.f32.mrf.mxu3 }
 0x3dd   : > { %1758 = vst [vmem:[%s2268_s28 + $0x170] sm:$0xff] %v1658_v27 }
 0x3de   : > { %1774 = vst [vmem:[%s2268_s28 + $0x1f0] sm:$0xff] %v1706_v55 }
 0x3e0   : > { %v1565_v30 = vpop.f32.mrf.mxu0  ;;  %v1613_v24 = vpop.f32.mrf.mxu1 }
 0x3e1   : > { %1727 = vst [vmem:[%s2268_s28 + $0x78] sm:$0xff] %v1565_v30 }
 0x3e2   : > { %1743 = vst [vmem:[%s2268_s28 + $0xf8] sm:$0xff] %v1613_v24 }
 0x3e4   : > { %v1661_v31 = vpop.f32.mrf.mxu2  ;;  %v1709_v60 = vpop.f32.mrf.mxu3 }
 0x3e5   : > { %1759 = vst [vmem:[%s2268_s28 + $0x178] sm:$0xff] %v1661_v31 }
 0x3e6   : > { %1775 = vst [vmem:[%s2268_s28 + $0x1f8] sm:$0xff] %v1709_v60 }
 0x3e7 PF: > { %s15_s22 = sadd.s32 1, %s2175_s22   ;;  %s2815_s18 = smov %s2167_s20 }
 0x3e8   : > { %p12_p0 = scmp.ge.s32.totalorder %s15_s22, 6   ;;  %s2816_s19 = smov %s2171_s21 }
 0x3e9   : > { %s2817_s20 = smov %s2820_s23  ;;  %s2818_s21 = smov %s2824_s24 }
 0x3ea   :  { %14 = sbr.rel (!%p12_p0) target bundleno = 3 (0x3), region = 92 }

</bundles_post_ra>
